<compile_context>
chip_gen: v7x
topology: tpu7x:2x2x1
jax: 0.10.0
libtpu: 0.0.40
codegen_flags: <defaults>
</compile_context>

<pallas_src>
import functools

import jax
import jax.numpy as jnp
from jax.experimental import pallas as pl
from jax.experimental.pallas import tpu as pltpu

D_VIS = 1280  # fixed by the module: CrossAttention(1280, fuse_dim)
LANE = 128


def _round_up(x, m):
    return (x + m - 1) // m * m


def _pick_vmem_limit():
    # ~half of physical VMEM: 64 MiB on v5e/v6e (128 MiB), 32 MiB on v7x (64 MiB).
    try:
        cap = pltpu.get_tpu_info().vmem_capacity_bytes
    except Exception:
        cap = 64 << 20  # conservative (v7x-sized) fallback
    return max(32 << 20, min(64 << 20, cap // 2))


# --------------------------------------------------------------------------- #
# Kernel 1: L2 normalization + fused Q/K/V projection (batch-tiled, parallel). #
# --------------------------------------------------------------------------- #
def norm_qkv_kernel(x_ref, wqkv_ref, xnorm_ref, q_ref, kv_ref):
    fp = q_ref.shape[-1]

    # frozen-encoder postprocessing: L2 normalize along the feature dim (f32 math)
    x = x_ref[...].astype(jnp.float32)                               # (2, TB, 1280)
    inv = jax.lax.rsqrt(jnp.sum(x * x, axis=-1, keepdims=True) + 1e-12)
    xn = x * inv
    xnorm_ref[...] = xn.astype(xnorm_ref.dtype)

    # fused Q/K/V projection for BOTH modalities in one MXU call (M = 2*TB rows).
    two, tb, d = x.shape
    xb = xn.astype(jnp.bfloat16).reshape(two * tb, d)                # free reshape
    qkv = jnp.dot(xb, wqkv_ref[...], preferred_element_type=jnp.float32)
    qkv = qkv.astype(jnp.bfloat16).reshape(two, tb, 3 * fp)          # cast once
    q_ref[...] = qkv[:, :, :fp]
    kv_ref[...] = qkv[:, :, fp:]


# --------------------------------------------------------------------------- #
# Kernel 2: cross-attention (both directions) + alpha fusion + MLP head.       #
# Query batch is tiled; K/V of the full batch are VMEM-resident.               #
# --------------------------------------------------------------------------- #
def attn_fuse_mlp_kernel(alpha_ref, q_ref, kv_ref, wo_ref, bo_ref,
                         w1_ref, b1_ref, w2_ref, b2_ref, logits_ref,
                         *, batch_real):
    fp = q_ref.shape[-1]
    b_pad = kv_ref.shape[1]

    q_img = q_ref[0]                       # (TB, Fp) bf16; 1/sqrt(d) folded into Wq
    q_txt = q_ref[1]
    kv = kv_ref[...]                       # (2, b_pad, 2*Fp) bf16, full batch
    k_img, v_img = kv[0, :, :fp], kv[0, :, fp:]
    k_txt, v_txt = kv[1, :, :fp], kv[1, :, fp:]

    dims = (((1,), (1,)), ((), ()))        # q @ k^T without an explicit transpose

    def attend(q, k, v):
        s = jax.lax.dot_general(q, k, dims, preferred_element_type=jnp.float32)
        if batch_real < b_pad:             # mask zero-padded key rows (static)
            key_idx = jax.lax.broadcasted_iota(jnp.int32, s.shape, 1)
            s = jnp.where(key_idx < batch_real, s, -1e30)
        s = s - jnp.max(s, axis=-1, keepdims=True)
        p = jnp.exp(s)
        l = jnp.sum(p, axis=-1, keepdims=True)
        o = jnp.dot(p.astype(jnp.bfloat16), v, preferred_element_type=jnp.float32)
        # normalize the (TB, Fp) output instead of the (TB, B) score matrix
        return o * pl.reciprocal(l, approx=True)

    o_a = attend(q_img, k_txt, v_txt)      # fuser(image_features, text_features)
    o_b = attend(q_txt, k_img, v_img)      # fuser(text_features, image_features)

    # alpha*(o_a@Wo+bo) + (1-alpha)*(o_b@Wo+bo) == (alpha*o_a+(1-alpha)*o_b)@Wo+bo
    alpha = alpha_ref[0, 0]                # scalar read from SMEM
    mix = alpha * o_a + (1.0 - alpha) * o_b
    fusion = jnp.dot(mix.astype(jnp.bfloat16), wo_ref[...],
                     preferred_element_type=jnp.float32) + bo_ref[...]

    # MLP head: Linear -> ReLU -> Linear (lane-padded, bf16 MXU operands)
    h = jnp.dot(fusion.astype(jnp.bfloat16), w1_ref[...],
                preferred_element_type=jnp.float32) + b1_ref[...]
    h = jnp.maximum(h, 0.0)
    logits = jnp.dot(h.astype(jnp.bfloat16), w2_ref[...],
                     preferred_element_type=jnp.float32) + b2_ref[...]
    logits_ref[...] = logits.astype(logits_ref.dtype)


# --------------------------------------------------------------------------- #
# Parameter prep & wrapper                                                      #
# --------------------------------------------------------------------------- #
def prepare_params(params, fuse_dim, embd_dim, n_class):
    """Pad lane dims to 128, fold scale into Wq, fuse q/k/v, cast weights to bf16."""
    fp = _round_up(fuse_dim, LANE)
    ep = _round_up(embd_dim, LANE)
    cp = _round_up(n_class, LANE)

    def pad2(w, r, c):
        return jnp.pad(w, ((0, r - w.shape[0]), (0, c - w.shape[1])))

    wq = params["wq"] * (float(fuse_dim) ** -0.5)   # fold attention scale into Wq
    wqkv = jnp.concatenate(
        [pad2(wq, D_VIS, fp),
         pad2(params["wk"], D_VIS, fp),
         pad2(params["wv"], D_VIS, fp)], axis=1).astype(jnp.bfloat16)  # (1280, 3*Fp)

    return {
        "alpha": params["alpha"].astype(jnp.float32).reshape(1, 1),
        "wqkv": wqkv,
        "wo": pad2(params["wo"], fp, fp).astype(jnp.bfloat16),
        "bo": pad2(params["bo"], 1, fp).astype(jnp.float32),
        "w1": pad2(params["w1"], fp, ep).astype(jnp.bfloat16),
        "b1": pad2(params["b1"], 1, ep).astype(jnp.float32),
        "w2": pad2(params["w2"], ep, cp).astype(jnp.bfloat16),
        "b2": pad2(params["b2"], 1, cp).astype(jnp.float32),
    }


def llm2clip_forward(image_features, text_features, pparams, *, n_class, tile_b=256):
    B, D = image_features.shape
    assert D == D_VIS
    fp = pparams["wo"].shape[0]
    ep = pparams["w1"].shape[1]
    cp = pparams["w2"].shape[1]

    # Pre-stack modalities (no in-kernel concatenate) and pad the batch to a
    # multiple of the tile; the tile is a multiple of 16 so bf16 blocks never
    # cross (16,128) sublane tile boundaries.
    tile = min(tile_b, _round_up(B, 16))
    b_pad = _round_up(B, tile)
    x = jnp.stack([image_features, text_features], axis=0).astype(jnp.bfloat16)
    if b_pad != B:
        x = jnp.pad(x, ((0, 0), (0, b_pad - B), (0, 0)))

    grid = (b_pad // tile,)
    cparams = pltpu.CompilerParams(dimension_semantics=("parallel",),
                                   vmem_limit_bytes=_pick_vmem_limit())

    # Kernel 1: normalize + QKV projection, batch-tiled & pipelined.
    x_norm, q, kv = pl.pallas_call(
        norm_qkv_kernel,
        out_shape=(
            jax.ShapeDtypeStruct((2, b_pad, D_VIS), jnp.bfloat16),   # normalized feats
            jax.ShapeDtypeStruct((2, b_pad, fp), jnp.bfloat16),      # Q (scale folded)
            jax.ShapeDtypeStruct((2, b_pad, 2 * fp), jnp.bfloat16),  # K|V
        ),
        grid=grid,
        in_specs=[
            pl.BlockSpec((2, tile, D_VIS), lambda i: (0, i, 0)),
            pl.BlockSpec((D_VIS, 3 * fp), lambda i: (0, 0)),         # VMEM-resident
        ],
        out_specs=(
            pl.BlockSpec((2, tile, D_VIS), lambda i: (0, i, 0)),
            pl.BlockSpec((2, tile, fp), lambda i: (0, i, 0)),
            pl.BlockSpec((2, tile, 2 * fp), lambda i: (0, i, 0)),
        ),
        compiler_params=cparams,
    )(x, pparams["wqkv"])

    # Kernel 2: attention + fusion + MLP; K/V of the full batch stay resident.
    logits_pad = pl.pallas_call(
        functools.partial(attn_fuse_mlp_kernel, batch_real=B),
        out_shape=jax.ShapeDtypeStruct((b_pad, cp), jnp.float32),
        grid=grid,
        in_specs=[
            pl.BlockSpec(memory_space=pltpu.MemorySpace.SMEM),        # alpha scalar
            pl.BlockSpec((2, tile, fp), lambda i: (0, i, 0)),          # Q, query-tiled
            pl.BlockSpec((2, b_pad, 2 * fp), lambda i: (0, 0, 0)),     # K/V, full batch
            pl.BlockSpec((fp, fp), lambda i: (0, 0)),
            pl.BlockSpec((1, fp), lambda i: (0, 0)),
            pl.BlockSpec((fp, ep), lambda i: (0, 0)),
            pl.BlockSpec((1, ep), lambda i: (0, 0)),
            pl.BlockSpec((ep, cp), lambda i: (0, 0)),
            pl.BlockSpec((1, cp), lambda i: (0, 0)),
        ],
        out_specs=pl.BlockSpec((tile, cp), lambda i: (i, 0)),
        compiler_params=cparams,
    )(pparams["alpha"], q, kv, pparams["wo"], pparams["bo"],
      pparams["w1"], pparams["b1"], pparams["w2"], pparams["b2"])

    img_n = x_norm[0, :B]
    txt_n = x_norm[1, :B]
    logits = logits_pad[:B, :n_class]
    return img_n, txt_n, logits


def init_params(key, fuse_dim, embd_dim, n_class):
    """Reference-shaped (unpadded, f32) parameters, matching the torch module."""
    ks = jax.random.split(key, 10)
    s_in = 1.0 / (D_VIS ** 0.5)
    s_f = 1.0 / (fuse_dim ** 0.5)
    s_e = 1.0 / (embd_dim ** 0.5)
    return {
        # CrossAttention(1280, fuse_dim): q/k/v projections + output projection
        "wq": jax.random.normal(ks[0], (D_VIS, fuse_dim), jnp.float32) * s_in,
        "wk": jax.random.normal(ks[1], (D_VIS, fuse_dim), jnp.float32) * s_in,
        "wv": jax.random.normal(ks[2], (D_VIS, fuse_dim), jnp.float32) * s_in,
        "wo": jax.random.normal(ks[3], (fuse_dim, fuse_dim), jnp.float32) * s_f,
        "bo": jnp.zeros((1, fuse_dim), jnp.float32),
        # alpha = nn.Parameter(torch.randn(1))
        "alpha": jax.random.normal(ks[4], (1, 1), jnp.float32),
        # mlp: Linear(fuse_dim, embd_dim) -> ReLU -> Linear(embd_dim, Nclass)
        "w1": jax.random.normal(ks[5], (fuse_dim, embd_dim), jnp.float32) * s_f,
        "b1": jax.random.normal(ks[6], (1, embd_dim), jnp.float32) * 0.01,
        "w2": jax.random.normal(ks[7], (embd_dim, n_class), jnp.float32) * s_e,
        "b2": jax.random.normal(ks[8], (1, n_class), jnp.float32) * 0.01,
    }


if __name__ == "__main__":
    # TODO(synk): pretrained LLM2Vec (Llama-3-8B) and CLIP-ViT-L/14-336 towers are
    # not reproducible in a kernel; we feed synthetic 1280-dim encoder outputs.
    B, FUSE_DIM, EMBD_DIM, NCLASS = 8, 64, 32, 8

    key = jax.random.PRNGKey(0)
    k_img, k_txt, k_param = jax.random.split(key, 3)

    # stand-ins for vlm.get_image_features(pixels) / vlm.get_text_features(l2v.encode(...))
    image_features = jax.random.normal(k_img, (B, D_VIS), jnp.float32).astype(jnp.bfloat16)
    text_features = jax.random.normal(k_txt, (B, D_VIS), jnp.float32).astype(jnp.bfloat16)

    params = init_params(k_param, FUSE_DIM, EMBD_DIM, NCLASS)
    pparams = prepare_params(params, FUSE_DIM, EMBD_DIM, NCLASS)

    img_n, txt_n, logits = llm2clip_forward(
        image_features, text_features, pparams, n_class=NCLASS)
    jax.block_until_ready((img_n, txt_n, logits))

    assert img_n.shape == (B, D_VIS) and img_n.dtype == jnp.bfloat16
    assert txt_n.shape == (B, D_VIS) and txt_n.dtype == jnp.bfloat16
    assert logits.shape == (B, NCLASS) and logits.dtype == jnp.float32
    assert bool(jnp.all(jnp.isfinite(logits)))
    # normalized rows must have ~unit L2 norm (bf16 storage precision)
    nrm = jnp.linalg.norm(img_n.astype(jnp.float32), axis=-1)
    assert bool(jnp.all(jnp.abs(nrm - 1.0) < 2e-2))
    print("KERNEL_OK")
</pallas_src>

<mosaic_0001>
module attributes {stable_mosaic.version = 11 : i64} {
  func.func @norm_qkv_kernel(%arg0: i32, %arg1: memref<2x16x1280xbf16, #tpu.memory_space<vmem>>, %arg2: memref<1280x384xbf16, #tpu.memory_space<vmem>>, %arg3: memref<2x16x1280xbf16, #tpu.memory_space<vmem>>, %arg4: memref<2x16x128xbf16, #tpu.memory_space<vmem>>, %arg5: memref<2x16x256xbf16, #tpu.memory_space<vmem>>) attributes {dimension_semantics = [#tpu.dimension_semantics<parallel>], iteration_bounds = array<i64: 1>, scalar_prefetch = 0 : i64, scratch_operands = 0 : i64, tpu.core_type = #tpu.core_type<tc>, window_params = [{transform_indices = @transform_0, window_bounds = array<i64: 2, 16, 1280>}, {pipeline_mode = #tpu.pipeline_mode<synchronous>, transform_indices = @transform_1, window_bounds = array<i64: 1280, 384>}, {transform_indices = @transform_2, window_bounds = array<i64: 2, 16, 1280>}, {transform_indices = @transform_3, window_bounds = array<i64: 2, 16, 128>}, {transform_indices = @transform_4, window_bounds = array<i64: 2, 16, 256>}]} {
    %c0 = arith.constant 0 : index
    %c0_0 = arith.constant 0 : index
    %c0_1 = arith.constant 0 : index
    %0 = vector.load %arg1[%c0, %c0_0, %c0_1] : memref<2x16x1280xbf16, #tpu.memory_space<vmem>>, vector<2x16x1280xbf16>
    %1 = arith.extf %0 : vector<2x16x1280xbf16> to vector<2x16x1280xf32>
    %2 = arith.mulf %1, %1 : vector<2x16x1280xf32>
    %cst = arith.constant dense<0.000000e+00> : vector<2x16xf32>
    %3 = vector.multi_reduction <add>, %2, %cst [2] : vector<2x16x1280xf32> to vector<2x16xf32>
    %4 = vector.shape_cast %3 : vector<2x16xf32> to vector<2x16x1xf32>
    %cst_2 = arith.constant 9.99999996E-13 : f32
    %5 = vector.broadcast %cst_2 : f32 to vector<2x16x1xf32>
    %6 = arith.addf %4, %5 : vector<2x16x1xf32>
    %7 = math.rsqrt %6 : vector<2x16x1xf32>
    %8 = vector.broadcast %7 : vector<2x16x1xf32> to vector<2x16x1280xf32>
    %9 = arith.mulf %1, %8 : vector<2x16x1280xf32>
    %10 = arith.truncf %9 : vector<2x16x1280xf32> to vector<2x16x1280xbf16>
    %c0_3 = arith.constant 0 : index
    %c0_4 = arith.constant 0 : index
    %c0_5 = arith.constant 0 : index
    %11 = vector.load %arg3[%c0_3, %c0_4, %c0_5] : memref<2x16x1280xbf16, #tpu.memory_space<vmem>>, vector<2x16x1280xbf16>
    tpu.vector_store %arg3[%c0_3, %c0_4, %c0_5], %10 {strides = array<i32>} : memref<2x16x1280xbf16, #tpu.memory_space<vmem>>, vector<2x16x1280xbf16>,
    %12 = arith.truncf %9 : vector<2x16x1280xf32> to vector<2x16x1280xbf16>
    %13 = vector.shape_cast %12 : vector<2x16x1280xbf16> to vector<32x1280xbf16>
    %c0_6 = arith.constant 0 : index
    %c0_7 = arith.constant 0 : index
    %14 = vector.load %arg2[%c0_6, %c0_7] : memref<1280x384xbf16, #tpu.memory_space<vmem>>, vector<1280x384xbf16>
    %cst_8 = arith.constant dense<0.000000e+00> : vector<32x384xf32>
    %15 = tpu.matmul %13, %14, %cst_8 {dimension_numbers = #tpu.dot_dimension_numbers<[1], [0], [0], [1], [0, 0, 1, 1], [], []>} : vector<32x1280xbf16>, vector<1280x384xbf16>, vector<32x384xf32> -> vector<32x384xf32>
    %16 = arith.truncf %15 : vector<32x384xf32> to vector<32x384xbf16>
    %17 = vector.shape_cast %16 : vector<32x384xbf16> to vector<2x16x384xbf16>
    %18 = vector.extract_strided_slice %17 {offsets = [0, 0, 0], sizes = [2, 16, 128], strides = [1, 1, 1]} : vector<2x16x384xbf16> to vector<2x16x128xbf16>
    %c0_9 = arith.constant 0 : index
    %c0_10 = arith.constant 0 : index
    %c0_11 = arith.constant 0 : index
    %19 = vector.load %arg4[%c0_9, %c0_10, %c0_11] : memref<2x16x128xbf16, #tpu.memory_space<vmem>>, vector<2x16x128xbf16>
    tpu.vector_store %arg4[%c0_9, %c0_10, %c0_11], %18 {strides = array<i32>} : memref<2x16x128xbf16, #tpu.memory_space<vmem>>, vector<2x16x128xbf16>,
    %20 = vector.extract_strided_slice %17 {offsets = [0, 0, 128], sizes = [2, 16, 256], strides = [1, 1, 1]} : vector<2x16x384xbf16> to vector<2x16x256xbf16>
    %c0_12 = arith.constant 0 : index
    %c0_13 = arith.constant 0 : index
    %c0_14 = arith.constant 0 : index
    %21 = vector.load %arg5[%c0_12, %c0_13, %c0_14] : memref<2x16x256xbf16, #tpu.memory_space<vmem>>, vector<2x16x256xbf16>
    tpu.vector_store %arg5[%c0_12, %c0_13, %c0_14], %20 {strides = array<i32>} : memref<2x16x256xbf16, #tpu.memory_space<vmem>>, vector<2x16x256xbf16>,
    return
  }
  func.func @transform_0(%arg0: i32) -> (i32, i32, i32) {
    %c0_i32 = arith.constant 0 : i32
    %c0_i32_0 = arith.constant 0 : i32
    %c0_i32_1 = arith.constant 0 : i32
    return %c0_i32, %arg0, %c0_i32_0 : i32, i32, i32
  }
  func.func @transform_1(%arg0: i32) -> (i32, i32) {
    %c0_i32 = arith.constant 0 : i32
    %c0_i32_0 = arith.constant 0 : i32
    %c0_i32_1 = arith.constant 0 : i32
    return %c0_i32, %c0_i32_0 : i32, i32
  }
  func.func @transform_2(%arg0: i32) -> (i32, i32, i32) {
    %c0_i32 = arith.constant 0 : i32
    %c0_i32_0 = arith.constant 0 : i32
    %c0_i32_1 = arith.constant 0 : i32
    return %c0_i32, %arg0, %c0_i32_0 : i32, i32, i32
  }
  func.func @transform_3(%arg0: i32) -> (i32, i32, i32) {
    %c0_i32 = arith.constant 0 : i32
    %c0_i32_0 = arith.constant 0 : i32
    %c0_i32_1 = arith.constant 0 : i32
    return %c0_i32, %arg0, %c0_i32_0 : i32, i32, i32
  }
  func.func @transform_4(%arg0: i32) -> (i32, i32, i32) {
    %c0_i32 = arith.constant 0 : i32
    %c0_i32_0 = arith.constant 0 : i32
    %c0_i32_1 = arith.constant 0 : i32
    return %c0_i32, %arg0, %c0_i32_0 : i32, i32, i32
  }
}

</mosaic_0001>

<bundles_post_ra>
// kernel: tpu_custom_call.1
= control target key start
LH: loop header
LB: loop body
LE: loop exit
PB: predicated region body
PF: predicated region fallthrough
CT: control target
= control target key end

     0   :  { %10 = vsyncpa [#allocation3], 0  ;;  %s3965_s0 = inlined_call_operand.hbm [shape: bf16[2,16,1280], index: 0, kind: input, shape index: {}]   ;;  %s3966_s1 = inlined_call_operand.hbm [shape: bf16[1280,384], index: 1, kind: input, shape index: {}]   ;;  %s3967_s2 = inlined_call_operand.hbm [shape: bf16[2,16,1280], index: 2, kind: output, shape index: {0}]   ;;  %s3968_s3 = inlined_call_operand.hbm [shape: bf16[2,16,128], index: 3, kind: output, shape index: {1}]   ;;  %s3969_s4 = inlined_call_operand.hbm [shape: bf16[2,16,256], index: 4, kind: output, shape index: {2}]  }
   0x1   :  { %11 = vsyncpa [#allocation6], 0 }
   0x2   :  { %12 = vsyncpa [#allocation4], 0 }
   0x3   :  { %13 = vsyncpa [#allocation9], 0  ;;  %s3522_s15 = smov [#allocation2]   ;;  %s3404_s19 = scalar_lea.hbm %s3965_s0, 2560 }
   0x4   :  { %s19_s16 = sshll.u32 %s3522_s15, 4  ;;  %p3405_p0 = scmp.ne.s32.totalorder %s3965_s0, %s3404_s19  ;;  %s20_s16 = int_to_ptr.vmem [resolvable:$true] %s19_s16 }
   0x5   :  { %p3408_p1 = scmp.lt.u32.totalorder %s3404_s19, %s3965_s0 }
   0x7   :  { %p3410_p2 = pnand %p3408_p1, %p3405_p0 }
   0x9   :  { %3413 = shalt.err (!%p3410_p2)
}
   0xa   :  { %s3414_s24 = scalar_lea.vmem %s20_s16, 2560  ;;  %p3419_p4 = scmp.lt.s32.totalorder %s20_s16, %s20_s16 }
   0xb   :  { %p3415_p3 = scmp.ne.s32.totalorder %s20_s16, %s3414_s24  ;;  %p3420_p5 = scmp.lt.s32.totalorder %s3414_s24, %s3414_s24 }
   0xd   :  { %p3421_p6 = por %p3420_p5, %p3419_p4 }
   0xf   :  { %p3422_p7 = pnand %p3421_p6, %p3415_p3 }
  0x11   :  { %3425 = shalt.err (!%p3422_p7)
}
  0x12   :  { %s3523_s25 = smov 640   ;;  %s3524_s26 = smov 40  }
  0x13   :  { %25 = dma.hbm_to_vmem [thread:$0]  %s3965_s0, 2560, %s20_s16, [#allocation3], %s3523_s25, %s3523_s25, %s3524_s26  }
  0x14   :  { %s3525_s29 = smov [#allocation5]   ;;  %s3426_s7 = scalar_lea.hbm %s3966_s1, 30720 }
  0x15   :  { %s31_s30 = sshll.u32 %s3525_s29, 4  ;;  %p3427_p8 = scmp.ne.s32.totalorder %s3966_s1, %s3426_s7  ;;  %s32_s30 = int_to_ptr.vmem [resolvable:$true] %s31_s30 }
  0x16   :  { %p3430_p9 = scmp.lt.u32.totalorder %s3426_s7, %s3966_s1 }
  0x18   :  { %p3432_p10 = pnand %p3430_p9, %p3427_p8 }
  0x1a   :  { %3435 = shalt.err (!%p3432_p10)
}
  0x1b   :  { %s3436_s12 = scalar_lea.vmem %s32_s30, 30720  ;;  %p3441_p12 = scmp.lt.s32.totalorder %s32_s30, %s32_s30 }
  0x1c   :  { %p3437_p11 = scmp.ne.s32.totalorder %s32_s30, %s3436_s12  ;;  %p3442_p13 = scmp.lt.s32.totalorder %s3436_s12, %s3436_s12 }
  0x1e   :  { %p3443_p0 = por %p3442_p13, %p3441_p12 }
  0x20   :  { %p3444_p1 = pnand %p3443_p0, %p3437_p11 }
  0x22   :  { %3447 = shalt.err (!%p3444_p1)
}
  0x23   :  { %s3526_s0 = smov 192   ;;  %s3527_s13 = smov 12  }
  0x24   :  { %37 = dma.hbm_to_vmem [thread:$0]  %s3966_s1, 30720, %s32_s30, [#allocation6], %s3526_s0, %s3526_s0, %s3527_s13  }
  0x25   :  { %3514 = dma.done.wait [#allocation3], 2560  }
  0x26   :  { %3515 = vsyncadd [#allocation3], 4294964736 }
  0x27   :  { %3516 = dma.done.wait [#allocation6], 30720  }
  0x28   :  { %3517 = vsyncadd [#allocation6], 4294936576  ;;  %v45_v0 = vld [vmem:[#allocation2] sm:$0xff]  ;;  %v46_v1 = vld [vmem:[#allocation2 + $0x8] sm:$0xff]  ;;  %s3528_s1 = smov [#allocation7]  }
  0x29   :  { %v47_v2 = vld [vmem:[#allocation2 + $0x10] sm:$0xff]  ;;  %v3587_v3 = vunpack.c.l.bf16 %v45_v0  ;;  %v3589_v4 = vunpack.c.h.bf16 %v45_v0  ;;  %v3591_v5 = vunpack.c.l.bf16 %v46_v1  ;;  %v3593_v6 = vunpack.c.h.bf16 %v46_v1  ;;  %v48_v7 = vld [vmem:[#allocation2 + $0x18] sm:$0xff]  ;;  %v50_v10 = vld [vmem:[#allocation2 + $0x28] sm:$0xff]  ;;  %s2540_s16 = sshll.u32 %s3528_s1, 4  ;;  %s2541_s16 = int_to_ptr.vmem [resolvable:$true] %s2540_s16 }
  0x2a   :  { %v51_v11 = vld [vmem:[#allocation2 + $0x30] sm:$0xff]  ;;  %v3599_v12 = vunpack.c.l.bf16 %v47_v2  ;;  %v49_v14 = vld [vmem:[#allocation2 + $0x20] sm:$0xff]  ;;  %v3603_v15 = vunpack.c.h.bf16 %v47_v2  ;;  %v3605_v16 = vunpack.c.l.bf16 %v48_v7  ;;  %v52_v19 = vld [vmem:[#allocation2 + $0x38] sm:$0xff]  ;;  %v3609_v20 = vunpack.c.l.bf16 %v50_v10  ;;  %s3448_s17 = scalar_lea.vmem %s2541_s16, 2560  ;;  %p3453_p3 = scmp.lt.s32.totalorder %s2541_s16, %s2541_s16 }
  0x2b   :  { %v105_v8 = vmul.f32 %v3587_v3, %v3587_v3  ;;  %v106_v9 = vmul.f32 %v3589_v4, %v3589_v4  ;;  %v107_v13 = vmul.f32 %v3591_v5, %v3591_v5  ;;  %v108_v17 = vmul.f32 %v3593_v6, %v3593_v6  ;;  %v55_v25 = vld [vmem:[#allocation2 + $0x50] sm:$0xff]  ;;  %v56_v26 = vld [vmem:[#allocation2 + $0x58] sm:$0xff]  ;;  %v53_v31 = vld [vmem:[#allocation2 + $0x40] sm:$0xff]  ;;  %p3449_p2 = scmp.ne.s32.totalorder %s2541_s16, %s3448_s17  ;;  %p3454_p4 = scmp.lt.s32.totalorder %s3448_s17, %s3448_s17 }
  0x2c   :  { %v3611_v21 = vunpack.c.h.bf16 %v50_v10  ;;  %v3613_v22 = vunpack.c.l.bf16 %v51_v11  ;;  %v3615_v23 = vunpack.c.h.bf16 %v48_v7  ;;  %v3617_v24 = vunpack.c.h.bf16 %v51_v11  ;;  %v3076_v27 = vld [vmem:[#allocation5 + $0x4] ss:$12 sps:$4 sm:$0xff]   ;;  %v3080_v33 = vld [vmem:[#allocation5] ss:$12 sps:$4 sm:$0xff]   ;;  %v3082_v43 = vld [vmem:[#allocation5 + $0x1c] ss:$12 sps:$4 sm:$0xff]  }
  0x2d   :  { %v145_v18 = vadd.f32 %v106_v9, %v105_v8  ;;  %v3619_v28 = vunpack.c.l.bf16 %v49_v14  ;;  %v109_v29 = vmul.f32 %v3599_v12, %v3599_v12  ;;  %v3078_v32 = vld [vmem:[#allocation5 + $0x184] ss:$12 sps:$4 sm:$0xff]   ;;  %v3623_v34 = vunpack.c.l.bf16 %v52_v19  ;;  %1977 = vmatprep.subr.bf16.mxu1 %v3076_v27  ;;  %v3081_v38 = vld [vmem:[#allocation5 + $0x180] ss:$12 sps:$4 sm:$0xff]   ;;  %v3084_v50 = vld [vmem:[#allocation5 + $0x19c] ss:$12 sps:$4 sm:$0xff]   ;;  %p3455_p5 = por %p3454_p4, %p3453_p3 }
  0x2e   :  { %v115_v35 = vmul.f32 %v3609_v20, %v3609_v20  ;;  %v116_v36 = vmul.f32 %v3611_v21, %v3611_v21  ;;  %v117_v37 = vmul.f32 %v3613_v22, %v3613_v22  ;;  %v3631_v39 = vunpack.c.h.bf16 %v49_v14  ;;  %2030 = vmatprep.subr.bf16.mxu0 %v3078_v32  ;;  %v54_v45 = vld [vmem:[#allocation2 + $0x48] sm:$0xff]  ;;  %v57_v49 = vld [vmem:[#allocation2 + $0x60] sm:$0xff]  ;;  %1978 = vmatpush1.bf16.msra.mxu1 %v3080_v33  ;;  %v60_v7 = vld [vmem:[#allocation2 + $0x78] sm:$0xff] }
  0x2f   :  { %v146_v30 = vadd.f32 %v145_v18, %v107_v13  ;;  %v110_v40 = vmul.f32 %v3603_v15, %v3603_v15  ;;  %v111_v41 = vmul.f32 %v3605_v16, %v3605_v16  ;;  %v112_v44 = vmul.f32 %v3615_v23, %v3615_v23  ;;  %v3086_v51 = vld [vmem:[#allocation5 + $0x18] ss:$12 sps:$4 sm:$0xff]   ;;  %2031 = vmatpush1.bf16.msra.mxu0 %v3081_v38  ;;  %v3088_v61 = vld [vmem:[#allocation5 + $0x34] ss:$12 sps:$4 sm:$0xff]   ;;  %v58_v1 = vld [vmem:[#allocation2 + $0x68] sm:$0xff]  ;;  %p3456_p6 = pnand %p3455_p5, %p3449_p2 }
  0x30   :  { %v3639_v46 = vunpack.c.h.bf16 %v52_v19  ;;  %v118_v47 = vmul.f32 %v3617_v24, %v3617_v24  ;;  %v156_v48 = vadd.f32 %v116_v36, %v115_v35  ;;  %v3643_v53 = vunpack.c.l.bf16 %v55_v25  ;;  %1979 = vmatprep.subr.bf16.mxu1 %v3082_v43  ;;  %v3087_v56 = vld [vmem:[#allocation5 + $0x198] ss:$12 sps:$4 sm:$0xff]   ;;  %2032 = vmatprep.subr.bf16.mxu0 %v3084_v50  ;;  %v3090_v8 = vld [vmem:[#allocation5 + $0x1b4] ss:$12 sps:$4 sm:$0xff]   ;;  %v3093_v27 = vld [vmem:[#allocation5 + $0x1b0] ss:$12 sps:$4 sm:$0xff]  }
  0x31   :  { %v147_v42 = vadd.f32 %v146_v30, %v108_v17  ;;  %v3645_v54 = vunpack.c.h.bf16 %v55_v25  ;;  %v3647_v55 = vunpack.c.l.bf16 %v56_v26  ;;  %v3649_v57 = vunpack.c.l.bf16 %v53_v31  ;;  %v61_v14 = vld [vmem:[#allocation2 + $0x80] sm:$0xff]  ;;  %v3092_v17 = vld [vmem:[#allocation5 + $0x30] ss:$12 sps:$4 sm:$0xff]   ;;  %v3096_v35 = vld [vmem:[#allocation5 + $0x1cc] ss:$12 sps:$4 sm:$0xff]  }
  0x32   :  { %v3651_v58 = vunpack.c.h.bf16 %v53_v31  ;;  %v119_v59 = vmul.f32 %v3623_v34, %v3623_v34  ;;  %v157_v60 = vadd.f32 %v156_v48, %v117_v37  ;;  %v113_v62 = vmul.f32 %v3619_v28, %v3619_v28  ;;  %1980 = vmatpush1.bf16.msra.mxu1 %v3086_v51  ;;  %v3098_v48 = vld [vmem:[#allocation5 + $0x48] ss:$12 sps:$4 sm:$0xff]  }
  0x33   :  { %v148_v52 = vadd.f32 %v147_v42, %v109_v29  ;;  %v114_v63 = vmul.f32 %v3631_v39, %v3631_v39  ;;  %v3659_v2 = vunpack.c.h.bf16 %v56_v26  ;;  %v120_v9 = vmul.f32 %v3639_v46, %v3639_v46  ;;  %2033 = vmatpush1.bf16.msra.mxu0 %v3087_v56  ;;  %v3094_v29 = vld [vmem:[#allocation5 + $0x4c] ss:$12 sps:$4 sm:$0xff]   ;;  %1981 = vmatprep.subr.bf16.mxu1 %v3088_v61  ;;  %v59_v42 = vld [vmem:[#allocation2 + $0x70] sm:$0xff] }
  0x34   :  { %v158_v10 = vadd.f32 %v157_v60, %v118_v47  ;;  %v125_v11 = vmul.f32 %v3643_v53, %v3643_v53  ;;  %v126_v13 = vmul.f32 %v3645_v54, %v3645_v54  ;;  %v3667_v19 = vunpack.c.l.bf16 %v54_v45  ;;  %2034 = vmatprep.subr.bf16.mxu0 %v3090_v8  ;;  %v62_v51 = vld [vmem:[#allocation2 + $0x88] sm:$0xff] }
  0x35   :  { %v149_v0 = vadd.f32 %v148_v52, %v110_v40  ;;  %v3669_v25 = vunpack.c.l.bf16 %v57_v49  ;;  %v127_v26 = vmul.f32 %v3647_v55, %v3647_v55  ;;  %v3673_v30 = vunpack.c.h.bf16 %v54_v45 }
  0x36   :  { %v121_v31 = vmul.f32 %v3649_v57, %v3649_v57  ;;  %v122_v32 = vmul.f32 %v3651_v58, %v3651_v58  ;;  %v159_v33 = vadd.f32 %v158_v10, %v119_v59  ;;  %v3679_v37 = vunpack.c.h.bf16 %v57_v49  ;;  %1982 = vmatpush1.bf16.msra.mxu1 %v3092_v17  ;;  %v3100_v10 = vld [vmem:[#allocation5 + $0x64] ss:$12 sps:$4 sm:$0xff]  }
  0x37   :  { %v150_v18 = vadd.f32 %v149_v0, %v111_v41  ;;  %v128_v38 = vmul.f32 %v3659_v2, %v3659_v2  ;;  %v167_v40 = vadd.f32 %v126_v13, %v125_v11  ;;  %v3683_v43 = vunpack.c.l.bf16 %v58_v1  ;;  %2035 = vmatpush1.bf16.msra.mxu0 %v3093_v27  ;;  %1983 = vmatprep.subr.bf16.mxu1 %v3094_v29  ;;  %v3102_v11 = vld [vmem:[#allocation5 + $0x1e4] ss:$12 sps:$4 sm:$0xff]  }
  0x38   :  { %v160_v41 = vadd.f32 %v159_v33, %v120_v9  ;;  %v3685_v45 = vunpack.c.l.bf16 %v60_v7  ;;  %v3687_v47 = vunpack.c.h.bf16 %v60_v7  ;;  %v3691_v52 = vunpack.c.l.bf16 %v61_v14  ;;  %2036 = vmatprep.subr.bf16.mxu0 %v3096_v35 }
  0x39   :  { %v151_v36 = vadd.f32 %v150_v18, %v112_v44  ;;  %v129_v44 = vmul.f32 %v3669_v25, %v3669_v25  ;;  %v168_v49 = vadd.f32 %v167_v40, %v127_v26  ;;  %v123_v56 = vmul.f32 %v3667_v19, %v3667_v19  ;;  %v3104_v26 = vld [vmem:[#allocation5 + $0x60] ss:$12 sps:$4 sm:$0xff]  }
  0x3a   :  { %v124_v59 = vmul.f32 %v3673_v30, %v3673_v30  ;;  %v161_v60 = vadd.f32 %v160_v41, %v121_v31  ;;  %v3697_v61 = vunpack.c.h.bf16 %v58_v1  ;;  %v130_v7 = vmul.f32 %v3679_v37, %v3679_v37  ;;  %1984 = vmatpush1.bf16.msra.mxu1 %v3098_v48 }
  0x3b   :  { %v152_v50 = vadd.f32 %v151_v36, %v113_v62  ;;  %v3099_v62 = vld [vmem:[#allocation5 + $0x1c8] ss:$12 sps:$4 sm:$0xff]   ;;  %v169_v8 = vadd.f32 %v168_v49, %v128_v38  ;;  %v3701_v9 = vunpack.c.h.bf16 %v61_v14  ;;  %v3703_v17 = vunpack.c.l.bf16 %v59_v42  ;;  %v3105_v38 = vld [vmem:[#allocation5 + $0x1e0] ss:$12 sps:$4 sm:$0xff]   ;;  %1985 = vmatprep.subr.bf16.mxu1 %v3100_v10 }
  0x3c   :  { %v162_v13 = vadd.f32 %v161_v60, %v122_v32  ;;  %v135_v18 = vmul.f32 %v3685_v45, %v3685_v45  ;;  %v136_v1 = vmul.f32 %v3687_v47, %v3687_v47  ;;  %v63_v14 = vld [vmem:[#allocation2 + $0x90] sm:$0xff]  ;;  %v3711_v29 = vunpack.c.l.bf16 %v62_v51  ;;  %v3106_v32 = vld [vmem:[#allocation5 + $0x7c] ss:$12 sps:$4 sm:$0xff]   ;;  %2037 = vmatpush1.bf16.msra.mxu0 %v3099_v62  ;;  %v3110_v60 = vld [vmem:[#allocation5 + $0x78] ss:$12 sps:$4 sm:$0xff]  }
  0x3d   :  { %v153_v0 = vadd.f32 %v152_v50, %v114_v63  ;;  %v131_v63 = vmul.f32 %v3683_v43, %v3683_v43  ;;  %v170_v27 = vadd.f32 %v169_v8, %v129_v44  ;;  %v137_v31 = vmul.f32 %v3691_v52, %v3691_v52  ;;  %2038 = vmatprep.subr.bf16.mxu0 %v3102_v11  ;;  %v3108_v44 = vld [vmem:[#allocation5 + $0x1fc] ss:$12 sps:$4 sm:$0xff]   ;;  %v3112_v8 = vld [vmem:[#allocation5 + $0x94] ss:$12 sps:$4 sm:$0xff]  }
  0x3e   :  { %v163_v33 = vadd.f32 %v162_v13, %v123_v56  ;;  %v3715_v35 = vunpack.c.h.bf16 %v59_v42  ;;  %v132_v36 = vmul.f32 %v3697_v61, %v3697_v61  ;;  %v3719_v41 = vunpack.c.h.bf16 %v62_v51  ;;  %v64_v56 = vld [vmem:[#allocation2 + $0x98] sm:$0xff]  ;;  %1986 = vmatpush1.bf16.msra.mxu1 %v3104_v26  ;;  %v3114_v26 = vld [vmem:[#allocation5 + $0x214] ss:$12 sps:$4 sm:$0xff]  }
  0x3f   :  { %154 = vadd.xlane.f32.xlu0 %v153_v0  ;;  %v171_v40 = vadd.f32 %v170_v27, %v130_v7  ;;  %v138_v48 = vmul.f32 %v3701_v9, %v3701_v9  ;;  %v178_v50 = vadd.f32 %v136_v1, %v135_v18  ;;  %v133_v42 = vmul.f32 %v3703_v17, %v3703_v17 }
  0x40   :  { %v164_v49 = vadd.f32 %v163_v33, %v124_v59  ;;  %v3725_v62 = vunpack.c.l.bf16 %v63_v14  ;;  %v139_v51 = vmul.f32 %v3711_v29, %v3711_v29  ;;  %1987 = vmatprep.subr.bf16.mxu1 %v3106_v32  ;;  %v134_v10 = vmul.f32 %v3715_v35, %v3715_v35  ;;  %2039 = vmatpush1.bf16.msra.mxu0 %v3105_v38  ;;  %v3111_v59 = vld [vmem:[#allocation5 + $0x1f8] ss:$12 sps:$4 sm:$0xff]  }
  0x41   :  { %v172_v0 = vadd.f32 %v171_v40, %v131_v63  ;;  %v179_v7 = vadd.f32 %v178_v50, %v137_v31  ;;  %v3731_v13 = vunpack.c.h.bf16 %v63_v14  ;;  %v140_v18 = vmul.f32 %v3719_v41, %v3719_v41  ;;  %2040 = vmatprep.subr.bf16.mxu0 %v3108_v44  ;;  %v3116_v63 = vld [vmem:[#allocation5 + $0x90] ss:$12 sps:$4 sm:$0xff]   ;;  %v3118_v38 = vld [vmem:[#allocation5 + $0xac] ss:$12 sps:$4 sm:$0xff]  }
  0x42   :  { %1988 = vmatpush1.bf16.msra.mxu1 %v3110_v60  ;;  %v3735_v31 = vunpack.c.l.bf16 %v64_v56  ;;  %v141_v32 = vmul.f32 %v3725_v62, %v3725_v62  ;;  %v3117_v14 = vld [vmem:[#allocation5 + $0x210] ss:$12 sps:$4 sm:$0xff]   ;;  %v3739_v40 = vunpack.c.h.bf16 %v64_v56  ;;  %v3120_v44 = vld [vmem:[#allocation5 + $0x22c] ss:$12 sps:$4 sm:$0xff]  }
  0x43   :  { %165 = vadd.xlane.f32.xlu0 %v164_v49  ;;  %v173_v11 = vadd.f32 %v172_v0, %v132_v36  ;;  %v180_v1 = vadd.f32 %v179_v7, %v138_v48  ;;  %1989 = vmatprep.subr.bf16.mxu1 %v3112_v8  ;;  %v142_v48 = vmul.f32 %v3731_v13, %v3731_v13  ;;  %v3122_v49 = vld [vmem:[#allocation5 + $0xa8] ss:$12 sps:$4 sm:$0xff]   ;;  %v3124_v60 = vld [vmem:[#allocation5 + $0xc4] ss:$12 sps:$4 sm:$0xff]   ;;  %v3128_v56 = vld [vmem:[#allocation5 + $0xc0] ss:$12 sps:$4 sm:$0xff]  }
  0x44   :  { %2041 = vmatpush1.bf16.msra.mxu0 %v3111_v59  ;;  %v143_v0 = vmul.f32 %v3735_v31, %v3735_v31  ;;  %v3126_v7 = vld [vmem:[#allocation5 + $0x244] ss:$12 sps:$4 sm:$0xff]   ;;  %v144_v8 = vmul.f32 %v3739_v40, %v3739_v40 }
  0x45   :  { %v174_v27 = vadd.f32 %v173_v11, %v133_v42  ;;  %v181_v33 = vadd.f32 %v180_v1, %v139_v51  ;;  %2042 = vmatprep.subr.bf16.mxu0 %v3114_v26  ;;  %v3123_v42 = vld [vmem:[#allocation5 + $0x228] ss:$12 sps:$4 sm:$0xff]   ;;  %v3129_v11 = vld [vmem:[#allocation5 + $0x240] ss:$12 sps:$4 sm:$0xff]   ;;  %v3134_v26 = vld [vmem:[#allocation5 + $0xd8] ss:$12 sps:$4 sm:$0xff]  }
  0x46   :  { %1990 = vmatpush1.bf16.msra.mxu1 %v3116_v63  ;;  %v3132_v1 = vld [vmem:[#allocation5 + $0x25c] ss:$12 sps:$4 sm:$0xff]  }
  0x47   :  { %v175_v36 = vadd.f32 %v174_v27, %v134_v10  ;;  %v182_v50 = vadd.f32 %v181_v33, %v140_v18  ;;  %1991 = vmatprep.subr.bf16.mxu1 %v3118_v38  ;;  %v3130_v18 = vld [vmem:[#allocation5 + $0xdc] ss:$12 sps:$4 sm:$0xff]   ;;  %v3136_v27 = vld [vmem:[#allocation5 + $0xf4] ss:$12 sps:$4 sm:$0xff]  }
  0x48   :  { %2043 = vmatpush1.bf16.msra.mxu0 %v3117_v14  ;;  %v3138_v33 = vld [vmem:[#allocation5 + $0x274] ss:$12 sps:$4 sm:$0xff]   ;;  %v3140_v38 = vld [vmem:[#allocation5 + $0xf0] ss:$12 sps:$4 sm:$0xff]   ;;  %v3142_v14 = vld [vmem:[#allocation5 + $0x10c] ss:$12 sps:$4 sm:$0xff]  }
  0x49   :  { %176 = vadd.xlane.f32.xlu1 %v175_v36  ;;  %v183_v51 = vadd.f32 %v182_v50, %v141_v32  ;;  %2044 = vmatprep.subr.bf16.mxu0 %v3120_v44  ;;  %v3135_v32 = vld [vmem:[#allocation5 + $0x258] ss:$12 sps:$4 sm:$0xff]   ;;  %v3141_v36 = vld [vmem:[#allocation5 + $0x270] ss:$12 sps:$4 sm:$0xff]   ;;  %v3146_v50 = vld [vmem:[#allocation5 + $0x108] ss:$12 sps:$4 sm:$0xff]  }
  0x4a   :  { %1992 = vmatpush1.bf16.msra.mxu1 %v3122_v49  ;;  %v3147_v44 = vld [vmem:[#allocation5 + $0x288] ss:$12 sps:$4 sm:$0xff]   ;;  %v3148_v49 = vld [vmem:[#allocation5 + $0x124] ss:$12 sps:$4 sm:$0xff]  }
  0x4b   :  { %v184_v10 = vadd.f32 %v183_v51, %v142_v48  ;;  %1993 = vmatprep.subr.bf16.mxu1 %v3124_v60  ;;  %v3144_v48 = vld [vmem:[#allocation5 + $0x28c] ss:$12 sps:$4 sm:$0xff]  }
  0x4c   :  { %2045 = vmatpush1.bf16.msra.mxu0 %v3123_v42  ;;  %v3150_v42 = vld [vmem:[#allocation5 + $0x2a4] ss:$12 sps:$4 sm:$0xff]   ;;  %v3152_v60 = vld [vmem:[#allocation5 + $0x120] ss:$12 sps:$4 sm:$0xff]  }
  0x4d   :  { %v185_v59 = vadd.f32 %v184_v10, %v143_v0  ;;  %2046 = vmatprep.subr.bf16.mxu0 %v3126_v7  ;;  %v3154_v0 = vld [vmem:[#allocation5 + $0x13c] ss:$12 sps:$4 sm:$0xff]   ;;  %v3153_v51 = vld [vmem:[#allocation5 + $0x2a0] ss:$12 sps:$4 sm:$0xff]   ;;  %v3159_v10 = vld [vmem:[#allocation5 + $0x2b8] ss:$12 sps:$4 sm:$0xff]  }
  0x4e   :  { %1994 = vmatpush1.bf16.msra.mxu1 %v3128_v56  ;;  %v3156_v7 = vld [vmem:[#allocation5 + $0x2bc] ss:$12 sps:$4 sm:$0xff]   ;;  %v3158_v56 = vld [vmem:[#allocation5 + $0x138] ss:$12 sps:$4 sm:$0xff]  }
  0x4f   :  { %v186_v63 = vadd.f32 %v185_v59, %v144_v8  ;;  %1995 = vmatprep.subr.bf16.mxu1 %v3130_v18  ;;  %v3160_v8 = vld [vmem:[#allocation5 + $0x154] ss:$12 sps:$4 sm:$0xff]   ;;  %v3165_v18 = vld [vmem:[#allocation5 + $0x2d0] ss:$12 sps:$4 sm:$0xff]  }
  0x50   :  { %2047 = vmatpush1.bf16.msra.mxu0 %v3129_v11  ;;  %v3162_v59 = vld [vmem:[#allocation5 + $0x2d4] ss:$12 sps:$4 sm:$0xff]   ;;  %v3164_v11 = vld [vmem:[#allocation5 + $0x150] ss:$12 sps:$4 sm:$0xff]  }
  0x51   :  { %187 = vadd.xlane.f32.xlu1 %v186_v63  ;;  %2048 = vmatprep.subr.bf16.mxu0 %v3132_v1  ;;  %v3166_v1 = vld [vmem:[#allocation5 + $0x16c] ss:$12 sps:$4 sm:$0xff]   ;;  %v3170_v63 = vld [vmem:[#allocation5 + $0x168] ss:$12 sps:$4 sm:$0xff]  }
  0x52   :  { %1996 = vmatpush1.bf16.msra.mxu1 %v3134_v26  ;;  %v3168_v26 = vld [vmem:[#allocation5 + $0x2ec] ss:$12 sps:$4 sm:$0xff]  }
  0x53   :  { %1997 = vmatprep.subr.bf16.mxu1 %v3136_v27  ;;  %v3175_v27 = vld [vmem:[#allocation5 + $0xc8] ss:$12 sps:$4 sm:$0xff]  }
  0x54   :  { %2049 = vmatpush1.bf16.msra.mxu0 %v3135_v32  ;;  %v3171_v32 = vld [vmem:[#allocation5 + $0x2e8] ss:$12 sps:$4 sm:$0xff]  }
  0x55   :  { %2050 = vmatprep.subr.bf16.mxu0 %v3138_v33  ;;  %v3174_v33 = vld [vmem:[#allocation5 + $0x304] ss:$12 sps:$4 sm:$0xff]  }
  0x56   :  { %1998 = vmatpush1.bf16.msra.mxu1 %v3140_v38 }
  0x57   :  { %1999 = vmatprep.subr.bf16.mxu1 %v3142_v14 }
  0x58   :  { %2051 = vmatpush1.bf16.msra.mxu0 %v3141_v36 }
  0x59   :  { %2052 = vmatprep.subr.bf16.mxu0 %v3144_v48 }
  0x5a   :  { %2000 = vmatpush1.bf16.msra.mxu1 %v3146_v50 }
  0x5b   :  { %2001 = vmatprep.subr.bf16.mxu1 %v3148_v49 }
  0x5c   :  { %2053 = vmatpush1.bf16.msra.mxu0 %v3147_v44 }
  0x5d   :  { %2054 = vmatprep.subr.bf16.mxu0 %v3150_v42 }
  0x5e   :  { %2002 = vmatpush1.bf16.msra.mxu1 %v3152_v60 }
  0x5f   :  { %2003 = vmatprep.subr.bf16.mxu1 %v3154_v0 }
  0x60   :  { %2055 = vmatpush1.bf16.msra.mxu0 %v3153_v51 }
  0x61   :  { %2056 = vmatprep.subr.bf16.mxu0 %v3156_v7 }
  0x62   :  { %2004 = vmatpush1.bf16.msra.mxu1 %v3158_v56 }
  0x63   :  { %2005 = vmatprep.subr.bf16.mxu1 %v3160_v8 }
  0x64   :  { %2057 = vmatpush1.bf16.msra.mxu0 %v3159_v10 }
  0x65   :  { %2058 = vmatprep.subr.bf16.mxu0 %v3162_v59 }
  0x66   :  { %2006 = vmatpush1.bf16.msra.mxu1 %v3164_v11 }
  0x67   :  { %2007 = vmatprep.subr.bf16.mxu1 %v3166_v1 }
  0x68   :  { %2059 = vmatpush1.bf16.msra.mxu0 %v3165_v18 }
  0x69   :  { %2060 = vmatprep.subr.bf16.mxu0 %v3168_v26 }
  0x6a   :  { %2008 = vmatpush1.bf16.msra.mxu1 %v3170_v63 }
  0x6b   :  { %2891 = vmatprep.subr.bf16.mxu1 %v3175_v27 }
  0x6c   :  { %2061 = vmatpush1.bf16.msra.mxu0 %v3171_v32 }
  0x6d   :  { %2083 = vmatprep.subr.bf16.mxu0 %v3174_v33 }
  0xcc   :  { %v155_v38 = vpop.xlane.xlu0 %154 }
  0xcd   :  { %v189_v14 = vadd.f32 1e-12, %v155_v38 }
  0xcf   :  { %3396 = vrsqrt.f32 %v189_v14  ;;  %v3180_v14 = vld [vmem:[#allocation5 + $0xe0] ss:$12 sps:$4 sm:$0xff]  }
  0xd0   :  { %v166_v36 = vpop.xlane.xlu0 %165 }
  0xd1   :  { %v190_v48 = vadd.f32 1e-12, %v166_v36 }
  0xd3   :  { %3398 = vrsqrt.f32 %v190_v48 }
  0xd6   :  { %v177_v50 = vpop.xlane.xlu1 %176 }
  0xd7   :  { %v191_v49 = vadd.f32 1e-12, %v177_v50 }
  0xd9   :  { %v3397_v44 = vpop.eup %3396  ;;  %3400 = vrsqrt.f32 %v191_v49 }
  0xda   :  { %v197_v42 = vmul.f32 %v3397_v44, %v3587_v3  ;;  %v198_v60 = vmul.f32 %v3397_v44, %v3589_v4  ;;  %v199_v0 = vmul.f32 %v3397_v44, %v3591_v5  ;;  %v200_v51 = vmul.f32 %v3397_v44, %v3593_v6 }
  0xdb   :  { %v201_v7 = vmul.f32 %v3397_v44, %v3599_v12  ;;  %v3753_v56 = vmul.f32 %v3397_v44, %v3603_v15  ;;  %v203_v8 = vmul.f32 %v3397_v44, %v3605_v16  ;;  %v204_v11 = vmul.f32 %v3397_v44, %v3615_v23 }
  0xdc   :  { %v2852_v10 = vpack.c.bf16 %v198_v60, %v197_v42  ;;  %v2853_v59 = vpack.c.bf16 %v200_v51, %v199_v0  ;;  %v3759_v5 = vmul.f32 %v3397_v44, %v3619_v28  ;;  %v206_v6 = vmul.f32 %v3397_v44, %v3631_v39 }
  0xdd   :  { %v2854_v3 = vpack.c.bf16 %v3753_v56, %v201_v7  ;;  %v3399_v18 = vpop.eup %3398  ;;  %v2855_v4 = vpack.c.bf16 %v204_v11, %v203_v8 }
  0xde   :  { %357 = vst [vmem:[#allocation7] sm:$0xff] %v2852_v10  ;;  %358 = vst [vmem:[#allocation7 + $0x8] sm:$0xff] %v2853_v59  ;;  %v207_v12 = vmul.f32 %v3399_v18, %v3609_v20  ;;  %v208_v15 = vmul.f32 %v3399_v18, %v3611_v21  ;;  %v209_v16 = vmul.f32 %v3399_v18, %v3613_v22  ;;  %v188_v23 = vpop.xlane.xlu1 %187  ;;  %v3172_v22 = vld [vmem:[#allocation5 + $0x300] ss:$12 sps:$4 sm:$0xff]   ;;  %v3185_v59 = vld [vmem:[#allocation5 + $0xf8] ss:$12 sps:$4 sm:$0xff]  }
  0xdf   :  { %v210_v1 = vmul.f32 %v3399_v18, %v3617_v24  ;;  %359 = vst [vmem:[#allocation7 + $0x10] sm:$0xff] %v2854_v3  ;;  %v211_v26 = vmul.f32 %v3399_v18, %v3623_v34  ;;  %v3768_v63 = vmul.f32 %v3399_v18, %v3639_v46  ;;  %v213_v28 = vmul.f32 %v3399_v18, %v3649_v57  ;;  %v3176_v24 = vld [vmem:[#allocation5 + $0x8] ss:$12 sps:$4 sm:$0xff]  }
  0xe0   :  { %v214_v27 = vmul.f32 %v3399_v18, %v3651_v58  ;;  %360 = vst [vmem:[#allocation7 + $0x18] sm:$0xff] %v2855_v4  ;;  %v192_v39 = vadd.f32 1e-12, %v188_v23  ;;  %v3772_v20 = vpack.c.bf16 %v208_v15, %v198_v60  ;;  %v2857_v21 = vpack.c.bf16 %v208_v15, %v207_v12  ;;  %v3179_v46 = vld [vmem:[#allocation5 + $0x31c] ss:$12 sps:$4 sm:$0xff]  }
  0xe1   :  { %v3774_v32 = vpack.c.bf16 %v210_v1, %v200_v51  ;;  %v2858_v33 = vpack.c.bf16 %v210_v1, %v209_v16  ;;  %v3776_v38 = vpack.c.bf16 %v207_v12, %v197_v42  ;;  %v3778_v34 = vpack.c.bf16 %v209_v16, %v199_v0  ;;  %v3177_v42 = vld [vmem:[#allocation5 + $0x318] ss:$12 sps:$4 sm:$0xff]   ;;  %v3181_v60 = vld [vmem:[#allocation5 + $0x20] ss:$12 sps:$4 sm:$0xff]   ;;  %v3190_v1 = vld [vmem:[#allocation5 + $0x110] ss:$12 sps:$4 sm:$0xff]  }
  0xe2   :  { %3402 = vrsqrt.f32 %v192_v39  ;;  %362 = vst [vmem:[#allocation7 + $0x28] sm:$0xff] %v2857_v21  ;;  %2009 = vmatprep.mubr.bf16.mxu1 %v3772_v20  ;;  %v2859_v57 = vpack.c.bf16 %v3768_v63, %v211_v26  ;;  %v3783_v58 = vpack.c.bf16 %v211_v26, %v201_v7  ;;  %v3785_v36 = vpack.c.bf16 %v214_v27, %v204_v11 }
  0xe3   :  { %2062 = vmatprep.mubr.bf16.mxu0 %v3774_v32  ;;  %363 = vst [vmem:[#allocation7 + $0x30] sm:$0xff] %v2858_v33  ;;  %2010 = vmatmul.mubr.bf16.vlgmr.msra.gmra.mrb[0].mxu1 %v3776_v38  ;;  %v2860_v48 = vpack.c.bf16 %v214_v27, %v213_v28  ;;  %v3789_v50 = vpack.c.bf16 %v213_v28, %v203_v8  ;;  %v3401_v49 = vpop.eup %3400  ;;  %v3184_v8 = vld [vmem:[#allocation5 + $0x334] ss:$12 sps:$4 sm:$0xff]   ;;  %v3191_v28 = vld [vmem:[#allocation5 + $0x50] ss:$12 sps:$4 sm:$0xff]  }
  0xe4   :  { %2063 = vmatmul.mubr.bf16.vlgmr.msra.gmra.mrb[0].mxu0 %v3778_v34  ;;  %v215_v44 = vmul.f32 %v3399_v18, %v3667_v19  ;;  %2892 = vmatpush3.bf16.msra.mxu1 %v3176_v24  ;;  %364 = vst [vmem:[#allocation7 + $0x38] sm:$0xff] %v2859_v57  ;;  %v216_v0 = vmul.f32 %v3399_v18, %v3673_v30  ;;  %v3195_v57 = vld [vmem:[#allocation5 + $0x128] ss:$12 sps:$4 sm:$0xff]  }
  0xe5   :  { %2084 = vmatpush1.bf16.msra.mxu0 %v3172_v22  ;;  %v2856_v51 = vpack.c.bf16 %v206_v6, %v3759_v5  ;;  %2893 = vmatprep.subr.bf16.mxu1 %v3180_v14  ;;  %v218_v7 = vmul.f32 %v3401_v49, %v3645_v54  ;;  %v220_v10 = vmul.f32 %v3401_v49, %v3659_v2 }
  0xe6   :  { %2085 = vmatprep.subr.bf16.mxu0 %v3179_v46  ;;  %v217_v19 = vmul.f32 %v3401_v49, %v3643_v53  ;;  %365 = vst [vmem:[#allocation7 + $0x40] sm:$0xff] %v2860_v48  ;;  %v219_v11 = vmul.f32 %v3401_v49, %v3647_v55  ;;  %v3799_v3 = vmul.f32 %v3401_v49, %v3679_v37  ;;  %v3182_v53 = vld [vmem:[#allocation5 + $0x330] ss:$12 sps:$4 sm:$0xff]   ;;  %v3186_v55 = vld [vmem:[#allocation5 + $0x38] ss:$12 sps:$4 sm:$0xff]  }
  0xe7   :  { %v3802_v30 = vmul.f32 %v3401_v49, %v3669_v25  ;;  %v224_v18 = vmul.f32 %v3401_v49, %v3697_v61  ;;  %361 = vst [vmem:[#allocation7 + $0x20] sm:$0xff] %v2856_v51  ;;  %v223_v54 = vmul.f32 %v3401_v49, %v3683_v43  ;;  %v3806_v2 = vpack.c.bf16 %v216_v0, %v206_v6  ;;  %v3189_v61 = vld [vmem:[#allocation5 + $0x34c] ss:$12 sps:$4 sm:$0xff]  }
  0xe8   :  { %v2862_v4 = vpack.c.bf16 %v218_v7, %v217_v19  ;;  %v2861_v12 = vpack.c.bf16 %v216_v0, %v215_v44  ;;  %2894 = vmatpush3.bf16.msra.mxu1 %v3181_v60  ;;  %v2863_v15 = vpack.c.bf16 %v220_v10, %v219_v11  ;;  %v3811_v25 = vpack.c.bf16 %v215_v44, %v3759_v5  ;;  %v3187_v5 = vld [vmem:[#allocation5 + $0x348] ss:$12 sps:$4 sm:$0xff]  }
  0xe9   :  { %2086 = vmatpush1.bf16.msra.mxu0 %v3177_v42  ;;  %v2864_v37 = vpack.c.bf16 %v3799_v3, %v3802_v30  ;;  %2895 = vmatprep.subr.bf16.mxu1 %v3185_v59  ;;  %v2865_v16 = vpack.c.bf16 %v224_v18, %v223_v54  ;;  %v226_v43 = vmul.f32 %v3401_v49, %v3715_v35  ;;  %v3200_v42 = vld [vmem:[#allocation5 + $0x140] ss:$12 sps:$4 sm:$0xff]  }
  0xea   :  { %2087 = vmatprep.subr.bf16.mxu0 %v3184_v8  ;;  %367 = vst [vmem:[#allocation7 + $0x50] sm:$0xff] %v2862_v4  ;;  %366 = vst [vmem:[#allocation7 + $0x48] sm:$0xff] %v2861_v12  ;;  %v225_v6 = vmul.f32 %v3401_v49, %v3703_v17  ;;  %v3199_v49 = vld [vmem:[#allocation5 + $0x37c] ss:$12 sps:$4 sm:$0xff]   ;;  %v3214_v12 = vld [vmem:[#allocation5 + $0x3c4] ss:$12 sps:$4 sm:$0xff]  }
  0xeb   :  { %368 = vst [vmem:[#allocation7 + $0x58] sm:$0xff] %v2863_v15  ;;  %369 = vst [vmem:[#allocation7 + $0x60] sm:$0xff] %v2864_v37  ;;  %v3207_v4 = vld [vmem:[#allocation5 + $0x3a8] ss:$12 sps:$4 sm:$0xff]   ;;  %v3212_v15 = vld [vmem:[#allocation5 + $0x3c0] ss:$12 sps:$4 sm:$0xff]  }
  0xec   :  { %370 = vst [vmem:[#allocation7 + $0x68] sm:$0xff] %v2865_v16  ;;  %v2866_v23 = vpack.c.bf16 %v226_v43, %v225_v6  ;;  %v3403_v26 = vpop.eup %3402  ;;  %2896 = vmatpush3.bf16.msra.mxu1 %v3186_v55  ;;  %v3216_v55 = vld [vmem:[#allocation5 + $0x188] ss:$12 sps:$4 sm:$0xff]   ;;  %v3217_v16 = vld [vmem:[#allocation5 + $0x3d8] ss:$12 sps:$4 sm:$0xff]  }
  0xed   :  { %2088 = vmatpush1.bf16.msra.mxu0 %v3182_v53  ;;  %v228_v27 = vmul.f32 %v3403_v26, %v3687_v47  ;;  %v230_v39 = vmul.f32 %v3403_v26, %v3701_v9  ;;  %v227_v21 = vmul.f32 %v3403_v26, %v3685_v45  ;;  %v229_v35 = vmul.f32 %v3403_v26, %v3691_v52  ;;  %v3215_v53 = vld [vmem:[#allocation5 + $0x248] ss:$12 sps:$4 sm:$0xff]  }
  0xee   :  { %2089 = vmatprep.subr.bf16.mxu0 %v3189_v61  ;;  %371 = vst [vmem:[#allocation7 + $0x70] sm:$0xff] %v2866_v23  ;;  %2897 = vmatprep.subr.bf16.mxu1 %v3190_v1  ;;  %v3820_v17 = vmul.f32 %v3403_v26, %v3719_v41  ;;  %v3823_v22 = vmul.f32 %v3403_v26, %v3711_v29  ;;  %v3194_v41 = vld [vmem:[#allocation5 + $0x364] ss:$12 sps:$4 sm:$0xff]   ;;  %v3219_v37 = vld [vmem:[#allocation5 + $0x3dc] ss:$12 sps:$4 sm:$0xff]  }
  0xef   :  { %v234_v24 = vmul.f32 %v3403_v26, %v3731_v13  ;;  %v233_v33 = vmul.f32 %v3403_v26, %v3725_v62  ;;  %v3827_v47 = vpack.c.bf16 %v228_v27, %v218_v7  ;;  %v3829_v9 = vpack.c.bf16 %v230_v39, %v220_v10  ;;  %v3192_v62 = vld [vmem:[#allocation5 + $0x360] ss:$12 sps:$4 sm:$0xff]   ;;  %v3196_v13 = vld [vmem:[#allocation5 + $0x68] ss:$12 sps:$4 sm:$0xff]   ;;  %v3197_v7 = vld [vmem:[#allocation5 + $0x378] ss:$12 sps:$4 sm:$0xff]  }
  0xf0   :  { %v3831_v45 = vpack.c.bf16 %v227_v21, %v217_v19  ;;  %v2867_v52 = vpack.c.bf16 %v228_v27, %v227_v21  ;;  %v3833_v46 = vpack.c.bf16 %v229_v35, %v219_v11  ;;  %v2868_v14 = vpack.c.bf16 %v230_v39, %v229_v35  ;;  %2898 = vmatpush3.bf16.msra.mxu1 %v3191_v28  ;;  %v3201_v10 = vld [vmem:[#allocation5 + $0x80] ss:$12 sps:$4 sm:$0xff]   ;;  %v3205_v19 = vld [vmem:[#allocation5 + $0x158] ss:$12 sps:$4 sm:$0xff]   ;;  %v3222_v23 = vld [vmem:[#allocation5 + $0x3f0] ss:$12 sps:$4 sm:$0xff]  }
  0xf1   :  { %2090 = vmatpush1.bf16.msra.mxu0 %v3187_v5  ;;  %2019 = vmatprep.mubr.bf16.mxu1 %v3827_v47  ;;  %v3839_v29 = vpack.c.bf16 %v3768_v63, %v3753_v56  ;;  %v2869_v48 = vpack.c.bf16 %v3820_v17, %v3823_v22  ;;  %v3843_v44 = vpack.c.bf16 %v234_v24, %v224_v18  ;;  %v3209_v11 = vld [vmem:[#allocation5 + $0x3ac] ss:$12 sps:$4 sm:$0xff]   ;;  %v3210_v18 = vld [vmem:[#allocation5 + $0x170] ss:$12 sps:$4 sm:$0xff]   ;;  %v3235_v21 = vld [vmem:[#allocation5 + $0x2a8] ss:$12 sps:$4 sm:$0xff]  }
  0xf2   :  { %2072 = vmatprep.mubr.bf16.mxu0 %v3829_v9  ;;  %372 = vst [vmem:[#allocation7 + $0x78] sm:$0xff] %v2867_v52  ;;  %2020 = vmatmul.mubr.bf16.gmra.mrb[4].mxu1 %v3831_v45  ;;  %373 = vst [vmem:[#allocation7 + $0x80] sm:$0xff] %v2868_v14  ;;  %v3847_v60 = vpack.c.bf16 %v233_v33, %v223_v54  ;;  %v2870_v0 = vpack.c.bf16 %v234_v24, %v233_v33  ;;  %v3211_v54 = vld [vmem:[#allocation5 + $0xb0] ss:$12 sps:$4 sm:$0xff]   ;;  %v3220_v61 = vld [vmem:[#allocation5 + $0x260] ss:$12 sps:$4 sm:$0xff]  }
  0xf3   :  { %2073 = vmatmul.mubr.bf16.gmra.mrb[4].mxu0 %v3833_v46  ;;  %v236_v56 = vmul.f32 %v3403_v26, %v3739_v40  ;;  %2274 = vmatprep.mubr.bf16.mxu1 %v3772_v20  ;;  %374 = vst [vmem:[#allocation7 + $0x88] sm:$0xff] %v2869_v48  ;;  %v235_v63 = vmul.f32 %v3403_v26, %v3735_v31  ;;  %v3204_v40 = vld [vmem:[#allocation5 + $0x394] ss:$12 sps:$4 sm:$0xff]   ;;  %v3202_v31 = vld [vmem:[#allocation5 + $0x390] ss:$12 sps:$4 sm:$0xff]  }
  0xf4   :  { %2115 = vmatprep.mubr.bf16.mxu0 %v3839_v29  ;;  %2091 = vmatprep.subr.bf16.mxu0 %v3194_v41  ;;  %375 = vst [vmem:[#allocation7 + $0x90] sm:$0xff] %v2870_v0  ;;  %v3206_v20 = vld [vmem:[#allocation5 + $0x98] ss:$12 sps:$4 sm:$0xff]   ;;  %v3230_v28 = vld [vmem:[#allocation5 + $0x290] ss:$12 sps:$4 sm:$0xff]  }
  0xf5   :  { %2899 = vmatprep.subr.bf16.mxu1 %v3195_v57  ;;  %v3853_v51 = vpack.c.bf16 %v236_v56, %v226_v43  ;;  %2092 = vmatpush1.bf16.msra.mxu0 %v3192_v62  ;;  %v3855_v8 = vpack.c.bf16 %v235_v63, %v225_v6  ;;  %v2871_v59 = vpack.c.bf16 %v236_v56, %v235_v63  ;;  %v3221_v43 = vld [vmem:[#allocation5 + $0x1a0] ss:$12 sps:$4 sm:$0xff]   ;;  %v3225_v1 = vld [vmem:[#allocation5 + $0x278] ss:$12 sps:$4 sm:$0xff]   ;;  %v3231_v27 = vld [vmem:[#allocation5 + $0x1d0] ss:$12 sps:$4 sm:$0xff]  }
  0xf6   :  { %2900 = vmatpush3.bf16.msra.mxu1 %v3196_v13  ;;  %2093 = vmatprep.subr.bf16.mxu0 %v3199_v49  ;;  %v3224_v6 = vld [vmem:[#allocation5 + $0x3f4] ss:$12 sps:$4 sm:$0xff]   ;;  %v3226_v26 = vld [vmem:[#allocation5 + $0x1b8] ss:$12 sps:$4 sm:$0xff]   ;;  %v3239_v33 = vld [vmem:[#allocation5 + $0x43c] ss:$12 sps:$4 sm:$0xff]  }
  0xf7   :  { %2901 = vmatprep.subr.bf16.mxu1 %v3200_v42  ;;  %376 = vst [vmem:[#allocation7 + $0x98] sm:$0xff] %v2871_v59  ;;  %v3229_v5 = vld [vmem:[#allocation5 + $0x40c] ss:$12 sps:$4 sm:$0xff]   ;;  %v3234_v39 = vld [vmem:[#allocation5 + $0x424] ss:$12 sps:$4 sm:$0xff]  }
  0xf8   :  { %v3232_v35 = vld [vmem:[#allocation5 + $0x420] ss:$12 sps:$4 sm:$0xff]   ;;  %v3236_v24 = vld [vmem:[#allocation5 + $0x1e8] ss:$12 sps:$4 sm:$0xff]   ;;  %v3242_v41 = vld [vmem:[#allocation5 + $0x450] ss:$12 sps:$4 sm:$0xff]  }
  0xf9   :  { %2094 = vmatpush1.bf16.msra.mxu0 %v3197_v7  ;;  %v3241_v52 = vld [vmem:[#allocation5 + $0x200] ss:$12 sps:$4 sm:$0xff]   ;;  %v3246_v57 = vld [vmem:[#allocation5 + $0x218] ss:$12 sps:$4 sm:$0xff]   ;;  %v3250_v13 = vld [vmem:[#allocation5 + $0x2f0] ss:$12 sps:$4 sm:$0xff]   ;;  %v3863_v7 = vpack.c.bf16 %v3820_v17, %v3799_v3  ;;  %v3871_v17 = vpack.c.bf16 %v3823_v22, %v3802_v30 }
  0xfa   :  { %2902 = vmatpush3.bf16.msra.mxu1 %v3201_v10  ;;  %2095 = vmatprep.subr.bf16.mxu0 %v3204_v40  ;;  %v3244_v14 = vld [vmem:[#allocation5 + $0x454] ss:$12 sps:$4 sm:$0xff]   ;;  %v3249_v62 = vld [vmem:[#allocation5 + $0x46c] ss:$12 sps:$4 sm:$0xff]   ;;  %v3251_v49 = vld [vmem:[#allocation5 + $0x230] ss:$12 sps:$4 sm:$0xff]  }
  0xfb   :  { %2903 = vmatprep.subr.bf16.mxu1 %v3205_v19  ;;  %v3247_v48 = vld [vmem:[#allocation5 + $0x468] ss:$12 sps:$4 sm:$0xff]   ;;  %v3254_v42 = vld [vmem:[#allocation5 + $0x484] ss:$12 sps:$4 sm:$0xff]   ;;  %v3252_v56 = vld [vmem:[#allocation5 + $0x480] ss:$12 sps:$4 sm:$0xff]  }
  0xfc   :  { %v3255_v0 = vld [vmem:[#allocation5 + $0x3c8] ss:$12 sps:$4 sm:$0xff]   ;;  %v3260_v59 = vld [vmem:[#allocation5 + $0x3e0] ss:$12 sps:$4 sm:$0xff]   ;;  %v3257_v40 = vld [vmem:[#allocation5 + $0x498] ss:$12 sps:$4 sm:$0xff]  }
  0xfd   :  { %2096 = vmatpush1.bf16.msra.mxu0 %v3202_v31  ;;  %v3256_v63 = vld [vmem:[#allocation5 + $0x308] ss:$12 sps:$4 sm:$0xff]   ;;  %v3261_v19 = vld [vmem:[#allocation5 + $0x320] ss:$12 sps:$4 sm:$0xff]   ;;  %v3262_v3 = vld [vmem:[#allocation5 + $0x4b0] ss:$12 sps:$4 sm:$0xff]  }
  0xfe   :  { %2904 = vmatpush3.bf16.msra.mxu1 %v3206_v20  ;;  %2097 = vmatprep.subr.bf16.mxu0 %v3209_v11  ;;  %v3259_v10 = vld [vmem:[#allocation5 + $0x49c] ss:$12 sps:$4 sm:$0xff]   ;;  %v3264_v31 = vld [vmem:[#allocation5 + $0x4b4] ss:$12 sps:$4 sm:$0xff]   ;;  %v3265_v20 = vld [vmem:[#allocation5 + $0x3f8] ss:$12 sps:$4 sm:$0xff]  }
  0xff   :  { %2905 = vmatprep.subr.bf16.mxu1 %v3210_v18  ;;  %v3269_v11 = vld [vmem:[#allocation5 + $0x4cc] ss:$12 sps:$4 sm:$0xff]   ;;  %v3270_v18 = vld [vmem:[#allocation5 + $0x410] ss:$12 sps:$4 sm:$0xff]   ;;  %v3275_v30 = vld [vmem:[#allocation5 + $0x428] ss:$12 sps:$4 sm:$0xff]  }
 0x100   :  { %v3272_v22 = vld [vmem:[#allocation5 + $0x4e0] ss:$12 sps:$4 sm:$0xff]  }
 0x101   :  { %2098 = vmatpush1.bf16.msra.mxu0 %v3207_v4  ;;  %v3271_v4 = vld [vmem:[#allocation5 + $0x350] ss:$12 sps:$4 sm:$0xff]  }
 0x102   :  { %2906 = vmatpush3.bf16.msra.mxu1 %v3211_v54  ;;  %2099 = vmatprep.subr.bf16.mxu0 %v3214_v12  ;;  %v3274_v54 = vld [vmem:[#allocation5 + $0x4e4] ss:$12 sps:$4 sm:$0xff]   ;;  %v3276_v12 = vld [vmem:[#allocation5 + $0x368] ss:$12 sps:$4 sm:$0xff]  }
 0x103   :  { %2919 = vmatprep.subr.bf16.mxu1 %v3215_v53  ;;  %v3279_v53 = vld [vmem:[#allocation5 + $0x4fc] ss:$12 sps:$4 sm:$0xff]  }
 0x105   :  { %2275 = vmatmul.mubr.bf16.vlgmr.msra.gmra.mrb[8].mxu1 %v3776_v38  ;;  %2100 = vmatpush1.bf16.msra.mxu0 %v3212_v15  ;;  %v3227_v38 = vld [vmem:[#allocation5 + $0x408] ss:$12 sps:$4 sm:$0xff]   ;;  %v3277_v15 = vld [vmem:[#allocation5 + $0x4f8] ss:$12 sps:$4 sm:$0xff]  }
 0x106   :  { %2920 = vmatpush3.bf16.msra.mxu1 %v3216_v55  ;;  %2101 = vmatprep.subr.bf16.mxu0 %v3219_v37  ;;  %v3281_v55 = vld [vmem:[#allocation5 + $0x380] ss:$12 sps:$4 sm:$0xff]  }
 0x107   :  { %2921 = vmatprep.subr.bf16.mxu1 %v3220_v61  ;;  %2282 = vmatprep.mubr.bf16.mxu1 %v3827_v47  ;;  %v3240_v47 = vld [vmem:[#allocation5 + $0x2c0] ss:$12 sps:$4 sm:$0xff]   ;;  %v3282_v61 = vld [vmem:[#allocation5 + $0x510] ss:$12 sps:$4 sm:$0xff]  }
 0x108   :  { %v3284_v37 = vld [vmem:[#allocation5 + $0x514] ss:$12 sps:$4 sm:$0xff]  }
 0x109   :  { %2102 = vmatpush1.bf16.msra.mxu0 %v3217_v16  ;;  %v3286_v16 = vld [vmem:[#allocation5 + $0x398] ss:$12 sps:$4 sm:$0xff]  }
 0x10a   :  { %2922 = vmatpush3.bf16.msra.mxu1 %v3221_v43  ;;  %2103 = vmatprep.subr.bf16.mxu0 %v3224_v6  ;;  %v3289_v43 = vld [vmem:[#allocation5 + $0x52c] ss:$12 sps:$4 sm:$0xff]   ;;  %v3290_v6 = vld [vmem:[#allocation5 + $0x470] ss:$12 sps:$4 sm:$0xff]  }
 0x10b   :  { %2923 = vmatprep.subr.bf16.mxu1 %v3225_v1  ;;  %v3287_v1 = vld [vmem:[#allocation5 + $0x528] ss:$12 sps:$4 sm:$0xff]  }
 0x10d   :  { %2283 = vmatmul.mubr.bf16.gmra.mrb[12].mxu1 %v3831_v45  ;;  %2104 = vmatpush1.bf16.msra.mxu0 %v3222_v23  ;;  %v3237_v45 = vld [vmem:[#allocation5 + $0x438] ss:$12 sps:$4 sm:$0xff]   ;;  %v3291_v23 = vld [vmem:[#allocation5 + $0x3b0] ss:$12 sps:$4 sm:$0xff]  }
 0x10e   :  { %2924 = vmatpush3.bf16.msra.mxu1 %v3226_v26  ;;  %2323 = vmatprep.mubr.bf16.mxu1 %v3774_v32  ;;  %v3245_v32 = vld [vmem:[#allocation5 + $0x2d8] ss:$12 sps:$4 sm:$0xff]  }
 0x10f   :  { %2105 = vmatprep.subr.bf16.mxu0 %v3229_v5  ;;  %2925 = vmatprep.subr.bf16.mxu1 %v3230_v28  ;;  %v3294_v26 = vld [vmem:[#allocation5 + $0x544] ss:$12 sps:$4 sm:$0xff]   ;;  %v3295_v5 = vld [vmem:[#allocation5 + $0x548] ss:$12 sps:$4 sm:$0xff]   ;;  %v3292_v28 = vld [vmem:[#allocation5 + $0x540] ss:$12 sps:$4 sm:$0xff]  }
 0x111   :  { %2106 = vmatpush1.bf16.msra.mxu0 %v3227_v38  ;;  %v3296_v38 = vld [vmem:[#allocation5 + $0x488] ss:$12 sps:$4 sm:$0xff]  }
 0x112   :  { %2926 = vmatpush3.bf16.msra.mxu1 %v3231_v27  ;;  %2107 = vmatprep.subr.bf16.mxu0 %v3234_v39  ;;  %v3299_v27 = vld [vmem:[#allocation5 + $0x55c] ss:$12 sps:$4 sm:$0xff]   ;;  %v3300_v39 = vld [vmem:[#allocation5 + $0x560] ss:$12 sps:$4 sm:$0xff]  }
 0x113   :  { %2927 = vmatprep.subr.bf16.mxu1 %v3235_v21  ;;  %v3297_v21 = vld [vmem:[#allocation5 + $0x558] ss:$12 sps:$4 sm:$0xff]  }
 0x115   :  { %2108 = vmatpush1.bf16.msra.mxu0 %v3232_v35  ;;  %v3301_v35 = vld [vmem:[#allocation5 + $0x4a0] ss:$12 sps:$4 sm:$0xff]  }
 0x116   :  { %2928 = vmatpush3.bf16.msra.mxu1 %v3236_v24  ;;  %2109 = vmatprep.subr.bf16.mxu0 %v3239_v33  ;;  %v3304_v24 = vld [vmem:[#allocation5 + $0x574] ss:$12 sps:$4 sm:$0xff]   ;;  %v3305_v33 = vld [vmem:[#allocation5 + $0x578] ss:$12 sps:$4 sm:$0xff]  }
 0x117   :  { %2929 = vmatprep.subr.bf16.mxu1 %v3240_v47  ;;  %v3302_v47 = vld [vmem:[#allocation5 + $0x570] ss:$12 sps:$4 sm:$0xff]  }
 0x119   :  { %2110 = vmatpush1.bf16.msra.mxu0 %v3237_v45  ;;  %v3306_v45 = vld [vmem:[#allocation5 + $0x4b8] ss:$12 sps:$4 sm:$0xff]  }
 0x11a   :  { %2930 = vmatpush3.bf16.msra.mxu1 %v3241_v52  ;;  %2111 = vmatprep.subr.bf16.mxu0 %v3244_v14  ;;  %v3309_v52 = vld [vmem:[#allocation5 + $0x58c] ss:$12 sps:$4 sm:$0xff]   ;;  %v3310_v14 = vld [vmem:[#allocation5 + $0x590] ss:$12 sps:$4 sm:$0xff]  }
 0x11b   :  { %2931 = vmatprep.subr.bf16.mxu1 %v3245_v32  ;;  %v3311_v32 = vld [vmem:[#allocation5 + $0x4d0] ss:$12 sps:$4 sm:$0xff]  }
 0x11d   :  { %2112 = vmatpush1.bf16.msra.mxu0 %v3242_v41  ;;  %v3314_v41 = vld [vmem:[#allocation5 + $0x5a4] ss:$12 sps:$4 sm:$0xff]  }
 0x11e   :  { %2932 = vmatpush3.bf16.msra.mxu1 %v3246_v57  ;;  %2113 = vmatprep.subr.bf16.mxu0 %v3249_v62  ;;  %v3315_v57 = vld [vmem:[#allocation5 + $0x5a8] ss:$12 sps:$4 sm:$0xff]   ;;  %v3312_v62 = vld [vmem:[#allocation5 + $0x5a0] ss:$12 sps:$4 sm:$0xff]  }
 0x11f   :  { %2933 = vmatprep.subr.bf16.mxu1 %v3250_v13  ;;  %v3316_v13 = vld [vmem:[#allocation5 + $0x4e8] ss:$12 sps:$4 sm:$0xff]  }
 0x121   :  { %2114 = vmatpush1.bf16.msra.mxu0 %v3247_v48  ;;  %v3319_v48 = vld [vmem:[#allocation5 + $0x5bc] ss:$12 sps:$4 sm:$0xff]  }
 0x122   :  { %2934 = vmatpush3.bf16.msra.mxu1 %v3251_v49  ;;  %2136 = vmatprep.subr.bf16.mxu0 %v3254_v42  ;;  %v3320_v49 = vld [vmem:[#allocation5 + $0x5c0] ss:$12 sps:$4 sm:$0xff]   ;;  %v3317_v42 = vld [vmem:[#allocation5 + $0x5b8] ss:$12 sps:$4 sm:$0xff]  }
 0x123   :  { %2947 = vmatprep.subr.bf16.mxu1 %v3255_v0  ;;  %v3321_v0 = vld [vmem:[#allocation5 + $0x500] ss:$12 sps:$4 sm:$0xff]  }
 0x124   :  { %2116 = vmatmul.mubr.bf16.vlgmr.msra.gmra.mrb[0].mxu0 %v3783_v58 }
 0x125   :  { %2324 = vmatmul.mubr.bf16.vlgmr.msra.gmra.mrb[16].mxu1 %v3778_v34  ;;  %2125 = vmatprep.mubr.bf16.mxu0 %v3863_v7  ;;  %v3266_v34 = vld [vmem:[#allocation5 + $0x338] ss:$12 sps:$4 sm:$0xff]  }
 0x126   :  { %2137 = vmatpush1.bf16.msra.mxu0 %v3252_v56  ;;  %2331 = vmatprep.mubr.bf16.mxu1 %v3829_v9  ;;  %v3267_v9 = vld [vmem:[#allocation5 + $0x4c8] ss:$12 sps:$4 sm:$0xff]  }
 0x127   :  { %2948 = vmatpush3.bf16.msra.mxu1 %v3256_v63  ;;  %2138 = vmatprep.subr.bf16.mxu0 %v3259_v10  ;;  %v3324_v56 = vld [vmem:[#allocation5 + $0x5d4] ss:$12 sps:$4 sm:$0xff]   ;;  %v3322_v63 = vld [vmem:[#allocation5 + $0x5d0] ss:$12 sps:$4 sm:$0xff]   ;;  %v3329_v10 = vld [vmem:[#allocation5 + $0x5ec] ss:$12 sps:$4 sm:$0xff]  }
 0x128   :  { %2949 = vmatprep.subr.bf16.mxu1 %v3260_v59  ;;  %v3330_v59 = vld [vmem:[#allocation5 + $0x5f0] ss:$12 sps:$4 sm:$0xff]  }
 0x12a   :  { %2139 = vmatpush1.bf16.msra.mxu0 %v3257_v40  ;;  %v3327_v40 = vld [vmem:[#allocation5 + $0x5e8] ss:$12 sps:$4 sm:$0xff]  }
 0x12b   :  { %2950 = vmatpush3.bf16.msra.mxu1 %v3261_v19  ;;  %2140 = vmatprep.subr.bf16.mxu0 %v3264_v31  ;;  %v3331_v19 = vld [vmem:[#allocation5 + $0x530] ss:$12 sps:$4 sm:$0xff]  }
 0x12c   :  { %2951 = vmatprep.subr.bf16.mxu1 %v3265_v20  ;;  %2126 = vmatmul.mubr.bf16.gmra.mrb[4].mxu0 %v3871_v17  ;;  %v3334_v31 = vld [vmem:[#allocation5 + $0x604] ss:$12 sps:$4 sm:$0xff]   ;;  %v3335_v20 = vld [vmem:[#allocation5 + $0x6c8] ss:$12 sps:$4 sm:$0xff]  }
 0x12d   :  { %2332 = vmatmul.mubr.bf16.gmra.mrb[20].mxu1 %v3833_v46  ;;  %2168 = vmatprep.mubr.bf16.mxu0 %v3785_v36  ;;  %v3280_v46 = vld [vmem:[#allocation5 + $0x440] ss:$12 sps:$4 sm:$0xff]  }
 0x12e   :  { %2141 = vmatpush1.bf16.msra.mxu0 %v3262_v3  ;;  %2372 = vmatprep.mubr.bf16.mxu1 %v3839_v29  ;;  %v3285_v29 = vld [vmem:[#allocation5 + $0x458] ss:$12 sps:$4 sm:$0xff]   ;;  %v3332_v3 = vld [vmem:[#allocation5 + $0x600] ss:$12 sps:$4 sm:$0xff]  }
 0x12f   :  { %2952 = vmatpush3.bf16.msra.mxu1 %v3266_v34  ;;  %2142 = vmatprep.subr.bf16.mxu0 %v3269_v11  ;;  %v3339_v34 = vld [vmem:[#allocation5 + $0x61c] ss:$12 sps:$4 sm:$0xff]   ;;  %v3340_v11 = vld [vmem:[#allocation5 + $0x6e0] ss:$12 sps:$4 sm:$0xff]  }
 0x130   :  { %2953 = vmatprep.subr.bf16.mxu1 %v3270_v18  ;;  %v3337_v18 = vld [vmem:[#allocation5 + $0x618] ss:$12 sps:$4 sm:$0xff]  }
 0x132   :  { %2143 = vmatpush1.bf16.msra.mxu0 %v3267_v9  ;;  %v3341_v9 = vld [vmem:[#allocation5 + $0x620] ss:$12 sps:$4 sm:$0xff]  }
 0x133   :  { %2954 = vmatpush3.bf16.msra.mxu1 %v3271_v4  ;;  %2144 = vmatprep.subr.bf16.mxu0 %v3274_v54  ;;  %v3344_v4 = vld [vmem:[#allocation5 + $0x634] ss:$12 sps:$4 sm:$0xff]   ;;  %v3345_v54 = vld [vmem:[#allocation5 + $0x6f8] ss:$12 sps:$4 sm:$0xff]  }
 0x134   :  { %2955 = vmatprep.subr.bf16.mxu1 %v3275_v30  ;;  %v3342_v30 = vld [vmem:[#allocation5 + $0x630] ss:$12 sps:$4 sm:$0xff]  }
 0x136   :  { %2145 = vmatpush1.bf16.msra.mxu0 %v3272_v22  ;;  %v3346_v22 = vld [vmem:[#allocation5 + $0x638] ss:$12 sps:$4 sm:$0xff]  }
 0x137   :  { %2956 = vmatpush3.bf16.msra.mxu1 %v3276_v12  ;;  %2146 = vmatprep.subr.bf16.mxu0 %v3279_v53  ;;  %v3349_v12 = vld [vmem:[#allocation5 + $0x64c] ss:$12 sps:$4 sm:$0xff]   ;;  %v3351_v53 = vld [vmem:[#allocation5 + $0x650] ss:$12 sps:$4 sm:$0xff]  }
 0x138   :  { %2957 = vmatprep.subr.bf16.mxu1 %v3280_v46  ;;  %v3354_v46 = vld [vmem:[#allocation5 + $0x664] ss:$12 sps:$4 sm:$0xff]  }
 0x13a   :  { %2147 = vmatpush1.bf16.msra.mxu0 %v3277_v15  ;;  %v3355_v15 = vld [vmem:[#allocation5 + $0x728] ss:$12 sps:$4 sm:$0xff]  }
 0x13b   :  { %2958 = vmatpush3.bf16.msra.mxu1 %v3281_v55  ;;  %2148 = vmatprep.subr.bf16.mxu0 %v3284_v37  ;;  %v3352_v55 = vld [vmem:[#allocation5 + $0x660] ss:$12 sps:$4 sm:$0xff]   ;;  %v3356_v37 = vld [vmem:[#allocation5 + $0x668] ss:$12 sps:$4 sm:$0xff]  }
 0x13c   :  { %2959 = vmatprep.subr.bf16.mxu1 %v3285_v29  ;;  %v3359_v29 = vld [vmem:[#allocation5 + $0x67c] ss:$12 sps:$4 sm:$0xff]  }
 0x13e   :  { %2149 = vmatpush1.bf16.msra.mxu0 %v3282_v61  ;;  %v3357_v61 = vld [vmem:[#allocation5 + $0x678] ss:$12 sps:$4 sm:$0xff]  }
 0x13f   :  { %2960 = vmatpush3.bf16.msra.mxu1 %v3286_v16  ;;  %2150 = vmatprep.subr.bf16.mxu0 %v3289_v43  ;;  %v3364_v16 = vld [vmem:[#allocation5 + $0x694] ss:$12 sps:$4 sm:$0xff]   ;;  %v3365_v43 = vld [vmem:[#allocation5 + $0x758] ss:$12 sps:$4 sm:$0xff]  }
 0x140   :  { %2961 = vmatprep.subr.bf16.mxu1 %v3290_v6  ;;  %v3362_v6 = vld [vmem:[#allocation5 + $0x690] ss:$12 sps:$4 sm:$0xff]  }
 0x142   :  { %2151 = vmatpush1.bf16.msra.mxu0 %v3287_v1  ;;  %v3366_v1 = vld [vmem:[#allocation5 + $0x698] ss:$12 sps:$4 sm:$0xff]  }
 0x143   :  { %2962 = vmatpush3.bf16.msra.mxu1 %v3291_v23  ;;  %2152 = vmatprep.subr.bf16.mxu0 %v3294_v26  ;;  %v3369_v23 = vld [vmem:[#allocation5 + $0x6ac] ss:$12 sps:$4 sm:$0xff]   ;;  %v3370_v26 = vld [vmem:[#allocation5 + $0x770] ss:$12 sps:$4 sm:$0xff]  }
 0x144   :  { %2975 = vmatprep.subr.bf16.mxu1 %v3295_v5  ;;  %v3367_v5 = vld [vmem:[#allocation5 + $0x6a8] ss:$12 sps:$4 sm:$0xff]  }
 0x146   :  { %2373 = vmatmul.mubr.bf16.vlgmr.msra.gmra.mrb[24].mxu1 %v3783_v58  ;;  %2153 = vmatpush1.bf16.msra.mxu0 %v3292_v28  ;;  %v3307_v58 = vld [vmem:[#allocation5 + $0x588] ss:$12 sps:$4 sm:$0xff]   ;;  %v3371_v28 = vld [vmem:[#allocation5 + $0x6b0] ss:$12 sps:$4 sm:$0xff]  }
 0x147   :  { %2380 = vmatprep.mubr.bf16.mxu1 %v3863_v7  ;;  %2976 = vmatpush3.bf16.msra.mxu1 %v3296_v38  ;;  %v3326_v7 = vld [vmem:[#allocation5 + $0x518] ss:$12 sps:$4 sm:$0xff]  }
 0x148   :  { %2154 = vmatprep.subr.bf16.mxu0 %v3299_v27  ;;  %2977 = vmatprep.subr.bf16.mxu1 %v3300_v39  ;;  %v3374_v38 = vld [vmem:[#allocation5 + $0x6c4] ss:$12 sps:$4 sm:$0xff]   ;;  %v3372_v27 = vld [vmem:[#allocation5 + $0x6c0] ss:$12 sps:$4 sm:$0xff]   ;;  %v3377_v39 = vld [vmem:[#allocation5 + $0x6dc] ss:$12 sps:$4 sm:$0xff]  }
 0x14a   :  { %2155 = vmatpush1.bf16.msra.mxu0 %v3297_v21  ;;  %v3375_v21 = vld [vmem:[#allocation5 + $0x6d8] ss:$12 sps:$4 sm:$0xff]  }
 0x14b   :  { %2978 = vmatpush3.bf16.msra.mxu1 %v3301_v35  ;;  %2156 = vmatprep.subr.bf16.mxu0 %v3304_v24  ;;  %v3380_v35 = vld [vmem:[#allocation5 + $0x6f4] ss:$12 sps:$4 sm:$0xff]   ;;  %v3378_v24 = vld [vmem:[#allocation5 + $0x6f0] ss:$12 sps:$4 sm:$0xff]  }
 0x14c   :  { %2979 = vmatprep.subr.bf16.mxu1 %v3305_v33  ;;  %v3383_v33 = vld [vmem:[#allocation5 + $0x70c] ss:$12 sps:$4 sm:$0xff]  }
 0x14e   :  { %2381 = vmatmul.mubr.bf16.gmra.mrb[28].mxu1 %v3871_v17  ;;  %2157 = vmatpush1.bf16.msra.mxu0 %v3302_v47  ;;  %v3336_v17 = vld [vmem:[#allocation5 + $0x608] ss:$12 sps:$4 sm:$0xff]  }
 0x14f   :  { %2980 = vmatpush3.bf16.msra.mxu1 %v3306_v45  ;;  %2421 = vmatprep.mubr.bf16.mxu1 %v3785_v36  ;;  %v3325_v36 = vld [vmem:[#allocation5 + $0x5d8] ss:$12 sps:$4 sm:$0xff]   ;;  %v3381_v47 = vld [vmem:[#allocation5 + $0x708] ss:$12 sps:$4 sm:$0xff]  }
 0x150   :  { %2158 = vmatprep.subr.bf16.mxu0 %v3309_v52  ;;  %2981 = vmatprep.subr.bf16.mxu1 %v3310_v14  ;;  %v3386_v45 = vld [vmem:[#allocation5 + $0x724] ss:$12 sps:$4 sm:$0xff]   ;;  %v3384_v52 = vld [vmem:[#allocation5 + $0x720] ss:$12 sps:$4 sm:$0xff]   ;;  %v3389_v14 = vld [vmem:[#allocation5 + $0x73c] ss:$12 sps:$4 sm:$0xff]  }
 0x152   :  { %2159 = vmatpush1.bf16.msra.mxu0 %v3307_v58  ;;  %v3387_v58 = vld [vmem:[#allocation5 + $0x738] ss:$12 sps:$4 sm:$0xff]  }
 0x153   :  { %2982 = vmatpush3.bf16.msra.mxu1 %v3311_v32  ;;  %2160 = vmatprep.subr.bf16.mxu0 %v3314_v41  ;;  %v3392_v32 = vld [vmem:[#allocation5 + $0x754] ss:$12 sps:$4 sm:$0xff]   ;;  %v3390_v41 = vld [vmem:[#allocation5 + $0x750] ss:$12 sps:$4 sm:$0xff]  }
 0x154   :  { %2983 = vmatprep.subr.bf16.mxu1 %v3315_v57  ;;  %v3395_v57 = vld [vmem:[#allocation5 + $0x76c] ss:$12 sps:$4 sm:$0xff]  }
 0x156   :  { %2161 = vmatpush1.bf16.msra.mxu0 %v3312_v62  ;;  %v3393_v62 = vld [vmem:[#allocation5 + $0x768] ss:$12 sps:$4 sm:$0xff]  }
 0x157   :  { %2984 = vmatpush3.bf16.msra.mxu1 %v3316_v13  ;;  %2162 = vmatprep.subr.bf16.mxu0 %v3319_v48 }
 0x158   :  { %2985 = vmatprep.subr.bf16.mxu1 %v3320_v49 }
 0x15a   :  { %2163 = vmatpush1.bf16.msra.mxu0 %v3317_v42 }
 0x15b   :  { %2986 = vmatpush3.bf16.msra.mxu1 %v3321_v0  ;;  %2164 = vmatprep.subr.bf16.mxu0 %v3324_v56 }
 0x15c   :  { %2987 = vmatprep.subr.bf16.mxu1 %v3325_v36 }
 0x15e   :  { %2165 = vmatpush1.bf16.msra.mxu0 %v3322_v63 }
 0x15f   :  { %2988 = vmatpush3.bf16.msra.mxu1 %v3326_v7  ;;  %2166 = vmatprep.subr.bf16.mxu0 %v3329_v10 }
 0x160   :  { %2989 = vmatprep.subr.bf16.mxu1 %v3330_v59 }
 0x162   :  { %2167 = vmatpush1.bf16.msra.mxu0 %v3327_v40 }
 0x163   :  { %2990 = vmatpush3.bf16.msra.mxu1 %v3331_v19  ;;  %2189 = vmatprep.subr.bf16.mxu0 %v3334_v31 }
 0x164   :  { %3003 = vmatprep.subr.bf16.mxu1 %v3335_v20 }
 0x165   :  { %2169 = vmatmul.mubr.bf16.vlgmr.msra.gmra.mrb[0].mxu0 %v3789_v50 }
 0x166   :  { %2422 = vmatmul.mubr.bf16.vlgmr.msra.gmra.mrb[32].mxu1 %v3789_v50  ;;  %2178 = vmatprep.mubr.bf16.mxu0 %v3843_v44  ;;  %v3350_v50 = vld [vmem:[#allocation5 + $0x710] ss:$12 sps:$4 sm:$0xff]  }
 0x167   :  { %2190 = vmatpush1.bf16.msra.mxu0 %v3332_v3  ;;  %2429 = vmatprep.mubr.bf16.mxu1 %v3843_v44  ;;  %v3347_v44 = vld [vmem:[#allocation5 + $0x648] ss:$12 sps:$4 sm:$0xff]  }
 0x168   :  { %3004 = vmatpush3.bf16.msra.mxu1 %v3336_v17  ;;  %2191 = vmatprep.subr.bf16.mxu0 %v3339_v34 }
 0x169   :  { %3005 = vmatprep.subr.bf16.mxu1 %v3340_v11 }
 0x16b   :  { %2192 = vmatpush1.bf16.msra.mxu0 %v3337_v18 }
 0x16c   :  { %3006 = vmatpush3.bf16.msra.mxu1 %v3341_v9  ;;  %2193 = vmatprep.subr.bf16.mxu0 %v3344_v4 }
 0x16d   :  { %2179 = vmatmul.mubr.bf16.gmra.mrb[4].mxu0 %v3847_v60  ;;  %3007 = vmatprep.subr.bf16.mxu1 %v3345_v54 }
 0x16e   :  { %2430 = vmatmul.mubr.bf16.gmra.mrb[36].mxu1 %v3847_v60  ;;  %2221 = vmatprep.mubr.bf16.mxu0 %v3806_v2  ;;  %v3360_v60 = vld [vmem:[#allocation5 + $0x740] ss:$12 sps:$4 sm:$0xff]  }
 0x16f   :  { %2194 = vmatpush1.bf16.msra.mxu0 %v3342_v30  ;;  %2470 = vmatprep.mubr.bf16.mxu1 %v3806_v2  ;;  %v3361_v2 = vld [vmem:[#allocation5 + $0x680] ss:$12 sps:$4 sm:$0xff]  }
 0x170   :  { %3008 = vmatpush3.bf16.msra.mxu1 %v3346_v22  ;;  %2195 = vmatprep.subr.bf16.mxu0 %v3349_v12 }
 0x171   :  { %3009 = vmatprep.subr.bf16.mxu1 %v3350_v50 }
 0x173   :  { %2196 = vmatpush1.bf16.msra.mxu0 %v3347_v44 }
 0x174   :  { %3010 = vmatpush3.bf16.msra.mxu1 %v3351_v53  ;;  %2197 = vmatprep.subr.bf16.mxu0 %v3354_v46 }
 0x175   :  { %3011 = vmatprep.subr.bf16.mxu1 %v3355_v15 }
 0x177   :  { %2198 = vmatpush1.bf16.msra.mxu0 %v3352_v55 }
 0x178   :  { %3012 = vmatpush3.bf16.msra.mxu1 %v3356_v37  ;;  %2199 = vmatprep.subr.bf16.mxu0 %v3359_v29 }
 0x179   :  { %3013 = vmatprep.subr.bf16.mxu1 %v3360_v60 }
 0x17b   :  { %2200 = vmatpush1.bf16.msra.mxu0 %v3357_v61 }
 0x17c   :  { %3014 = vmatpush3.bf16.msra.mxu1 %v3361_v2  ;;  %2201 = vmatprep.subr.bf16.mxu0 %v3364_v16 }
 0x17d   :  { %3015 = vmatprep.subr.bf16.mxu1 %v3365_v43 }
 0x17f   :  { %2202 = vmatpush1.bf16.msra.mxu0 %v3362_v6 }
 0x180   :  { %3016 = vmatpush3.bf16.msra.mxu1 %v3366_v1  ;;  %2203 = vmatprep.subr.bf16.mxu0 %v3369_v23 }
 0x181   :  { %3017 = vmatprep.subr.bf16.mxu1 %v3370_v26 }
 0x183   :  { %2204 = vmatpush1.bf16.msra.mxu0 %v3367_v5 }
 0x184   :  { %3018 = vmatpush3.bf16.msra.mxu1 %v3371_v28  ;;  %2205 = vmatprep.subr.bf16.mxu0 %v3374_v38 }
 0x187   :  { %2471 = vmatmul.mubr.bf16.vlgmr.msra.gmra.mrb[40].mxu1 %v3811_v25  ;;  %2206 = vmatpush1.bf16.msra.mxu0 %v3372_v27 }
 0x188   :  { %2478 = vmatprep.mubr.bf16.mxu1 %v3853_v51  ;;  %2207 = vmatprep.subr.bf16.mxu0 %v3377_v39 }
 0x18b   :  { %2208 = vmatpush1.bf16.msra.mxu0 %v3375_v21 }
 0x18c   :  { %2209 = vmatprep.subr.bf16.mxu0 %v3380_v35 }
 0x18f   :  { %2479 = vmatmul.mubr.bf16.gmra.mrb[44].mxu1 %v3855_v8  ;;  %2210 = vmatpush1.bf16.msra.mxu0 %v3378_v24 }
 0x190   :  { %2211 = vmatprep.subr.bf16.mxu0 %v3383_v33 }
 0x193   :  { %2212 = vmatpush1.bf16.msra.mxu0 %v3381_v47 }
 0x194   :  { %2213 = vmatprep.subr.bf16.mxu0 %v3386_v45 }
 0x197   :  { %2214 = vmatpush1.bf16.msra.mxu0 %v3384_v52 }
 0x198   :  { %2215 = vmatprep.subr.bf16.mxu0 %v3389_v14 }
 0x19b   :  { %2216 = vmatpush1.bf16.msra.mxu0 %v3387_v58 }
 0x19c   :  { %2217 = vmatprep.subr.bf16.mxu0 %v3392_v32 }
 0x19f   :  { %2218 = vmatpush1.bf16.msra.mxu0 %v3390_v41 }
 0x1a0   :  { %2219 = vmatprep.subr.bf16.mxu0 %v3395_v57 }
 0x1a3   :  { %2220 = vmatpush1.bf16.msra.mxu0 %v3393_v62 }
 0x1a6   :  { %2222 = vmatmul.mubr.bf16.vlgmr.msra.gmra.mrb[0].mxu0 %v3811_v25 }
 0x1a7   :  { %2231 = vmatprep.mubr.bf16.mxu0 %v3853_v51 }
 0x1ae   :  { %2232 = vmatmul.mubr.bf16.gmra.mrb[4].mxu0 %v3855_v8 }
 0x1b6   :  { %v3895_v13 = vpop.f32.mrb[0].mxu1 }
 0x1b7   :  { %v3897_v48 = vpop.f32.mrb[1].mxu1 }
 0x1b8   :  { %v3899_v49 = vpop.f32.mrb[2].mxu1 }
 0x1b9   :  { %v3901_v42 = vpop.f32.mrb[3].mxu1 }
 0x1c5   :  { %v3903_v0 = vpop.f32.mrb[4].mxu1 }
 0x1c6   :  { %v3905_v56 = vpop.f32.mrb[5].mxu1 }
 0x1c7   :  { %v3907_v36 = vpop.f32.mrb[6].mxu1 }
 0x1c8   :  { %v3909_v63 = vpop.f32.mrb[7].mxu1 }
 0x1d8   :  { %v2907_v25 = vpop.f32.mrb[8].mxu1 }
 0x1d9   :  { %v2908_v51 = vpop.f32.mrb[9].mxu1 }
 0x1da   :  { %v2909_v7 = vadd.f32 %v2908_v51, %v2907_v25  ;;  %v2910_v8 = vpop.f32.mrb[10].mxu1 }
 0x1db   :  { %v2911_v10 = vpop.f32.mrb[11].mxu1 }
 0x1dc   :  { %v2912_v59 = vadd.f32 %v2911_v10, %v2910_v8 }
 0x1e0   :  { %v2913_v40 = vpop.f32.mrb[12].mxu1 }
 0x1e1   :  { %v2914_v19 = vpop.f32.mrb[13].mxu1 }
 0x1e2   :  { %v2915_v31 = vadd.f32 %v2914_v19, %v2913_v40  ;;  %v2916_v20 = vpop.f32.mrb[14].mxu1 }
 0x1e3   :  { %v2917_v3 = vpop.f32.mrb[15].mxu1 }
 0x1e4   :  { %v2918_v17 = vadd.f32 %v2917_v3, %v2916_v20 }
 0x1f8   :  { %v2935_v34 = vpop.f32.mrb[16].mxu1 }
 0x1f9   :  { %v2936_v11 = vpop.f32.mrb[17].mxu1 }
 0x1fa   :  { %v2937_v18 = vadd.f32 %v2936_v11, %v2935_v34  ;;  %v2938_v9 = vpop.f32.mrb[18].mxu1 }
 0x1fb   :  { %v2939_v4 = vpop.f32.mrb[19].mxu1 }
 0x1fc   :  { %v2326_v54 = vadd.f32 %v2937_v18, %v2909_v7  ;;  %v2940_v30 = vadd.f32 %v2939_v4, %v2938_v9 }
 0x1fe   :  { %v2329_v22 = vadd.f32 %v2940_v30, %v2912_v59 }
 0x200   :  { %v2941_v12 = vpop.f32.mrb[20].mxu1 }
 0x201   :  { %v2942_v50 = vpop.f32.mrb[21].mxu1 }
 0x202   :  { %v2943_v44 = vadd.f32 %v2942_v50, %v2941_v12  ;;  %v2944_v53 = vpop.f32.mrb[22].mxu1 }
 0x203   :  { %v2945_v46 = vpop.f32.mrb[23].mxu1 }
 0x204   :  { %v2334_v15 = vadd.f32 %v2943_v44, %v2915_v31  ;;  %v2946_v55 = vadd.f32 %v2945_v46, %v2944_v53 }
 0x206   :  { %v2337_v37 = vadd.f32 %v2946_v55, %v2918_v17 }
 0x207   :  { %3459 = shalt.err (!%p3456_p6)
}
 0x208   :  { %s3460_s20 = scalar_lea.hbm %s3967_s2, 2560 }
 0x209   :  { %p3461_p7 = scmp.ne.s32.totalorder %s3967_s2, %s3460_s20  ;;  %p3464_p8 = scmp.lt.u32.totalorder %s3460_s20, %s3967_s2 }
 0x20b   :  { %p3466_p9 = pnand %p3464_p8, %p3461_p7 }
 0x20d   :  { %3469 = shalt.err (!%p3466_p9)
}
 0x20e   :  { %2546 = dma.vmem_to_hbm [thread:$0]  %s2541_s16, 2560, %s3967_s2, [#allocation4], %s3523_s25, %s3523_s25, %s3524_s26  }
 0x20f   :  { %s3529_s2 = smov [#allocation8]   ;;  %s3530_s26 = smov [#allocation10]  }
 0x210   :  { %s2552_s25 = sshll.u32 %s3529_s2, 4  ;;  %s2564_s29 = sshll.u32 %s3530_s26, 4  ;;  %s2553_s25 = int_to_ptr.vmem [resolvable:$true] %s2552_s25  ;;  %s3934_s29 = int_to_ptr.vmem [resolvable:$true] %s2564_s29 }
 0x211   :  { %s3470_s30 = scalar_lea.vmem %s2553_s25, 256  ;;  %p3475_p11 = scmp.lt.s32.totalorder %s2553_s25, %s2553_s25 }
 0x212   :  { %p3471_p10 = scmp.ne.s32.totalorder %s2553_s25, %s3470_s30  ;;  %p3476_p12 = scmp.lt.s32.totalorder %s3470_s30, %s3470_s30 }
 0x214   :  { %p3477_p13 = por %p3476_p12, %p3475_p11 }
 0x216   :  { %p3478_p0 = pnand %p3477_p13, %p3471_p10 }
 0x219   :  { %v2963_v29 = vpop.f32.mrb[24].mxu1 }
 0x21a   :  { %v2964_v60 = vpop.f32.mrb[25].mxu1 }
 0x21b   :  { %v2965_v61 = vadd.f32 %v2964_v60, %v2963_v29  ;;  %v2966_v2 = vpop.f32.mrb[26].mxu1 }
 0x21c   :  { %v2967_v16 = vpop.f32.mrb[27].mxu1 }
 0x21d   :  { %v2375_v43 = vadd.f32 %v2965_v61, %v2326_v54  ;;  %v2968_v6 = vadd.f32 %v2967_v16, %v2966_v2 }
 0x21f   :  { %v2378_v1 = vadd.f32 %v2968_v6, %v2329_v22 }
 0x221   :  { %v2969_v23 = vpop.f32.mrb[28].mxu1 }
 0x222   :  { %v2970_v26 = vpop.f32.mrb[29].mxu1 }
 0x223   :  { %v2971_v5 = vadd.f32 %v2970_v26, %v2969_v23  ;;  %v2972_v28 = vpop.f32.mrb[30].mxu1 }
 0x224   :  { %v2973_v38 = vpop.f32.mrb[31].mxu1 }
 0x225   :  { %v2383_v27 = vadd.f32 %v2971_v5, %v2334_v15  ;;  %v2974_v39 = vadd.f32 %v2973_v38, %v2972_v28 }
 0x227   :  { %v2386_v21 = vadd.f32 %v2974_v39, %v2337_v37 }
 0x239   :  { %v2991_v35 = vpop.f32.mrb[32].mxu1 }
 0x23a   :  { %v2992_v24 = vpop.f32.mrb[33].mxu1 }
 0x23b   :  { %v2993_v33 = vadd.f32 %v2992_v24, %v2991_v35  ;;  %v2994_v47 = vpop.f32.mrb[34].mxu1 }
 0x23c   :  { %v2995_v45 = vpop.f32.mrb[35].mxu1 }
 0x23d   :  { %v2424_v52 = vadd.f32 %v2993_v33, %v2375_v43  ;;  %v2996_v14 = vadd.f32 %v2995_v45, %v2994_v47 }
 0x23f   :  { %v2427_v58 = vadd.f32 %v2996_v14, %v2378_v1 }
 0x241   :  { %v2997_v32 = vpop.f32.mrb[36].mxu1 }
 0x242   :  { %v2998_v41 = vpop.f32.mrb[37].mxu1 }
 0x243   :  { %v2999_v57 = vadd.f32 %v2998_v41, %v2997_v32  ;;  %v3000_v62 = vpop.f32.mrb[38].mxu1 }
 0x244   :  { %v3001_v25 = vpop.f32.mrb[39].mxu1 }
 0x245   :  { %v2432_v51 = vadd.f32 %v2999_v57, %v2383_v27  ;;  %v3002_v7 = vadd.f32 %v3001_v25, %v3000_v62 }
 0x247   :  { %v2435_v8 = vadd.f32 %v3002_v7, %v2386_v21 }
 0x25a   :  { %v3019_v10 = vpop.f32.mrb[40].mxu1 }
 0x25b   :  { %v3020_v59 = vpop.f32.mrb[41].mxu1 }
 0x25c   :  { %v3021_v40 = vadd.f32 %v3020_v59, %v3019_v10  ;;  %v3022_v19 = vpop.f32.mrb[42].mxu1 }
 0x25d   :  { %v3023_v31 = vpop.f32.mrb[43].mxu1 }
 0x25e   :  { %v2473_v20 = vadd.f32 %v3021_v40, %v2424_v52  ;;  %v3024_v3 = vadd.f32 %v3023_v31, %v3022_v19 }
 0x260   :  { %v2476_v17 = vadd.f32 %v3024_v3, %v2427_v58 }
 0x262   :  { %v3025_v34 = vpop.f32.mrb[44].mxu1 }
 0x263   :  { %v3026_v11 = vpop.f32.mrb[45].mxu1 }
 0x264   :  { %v3027_v18 = vadd.f32 %v3026_v11, %v3025_v34  ;;  %v3028_v9 = vpop.f32.mrb[46].mxu1 }
 0x265   :  { %v3029_v4 = vpop.f32.mrb[47].mxu1 }
 0x266   :  { %v2481_v54 = vadd.f32 %v3027_v18, %v2432_v51  ;;  %v3030_v30 = vadd.f32 %v3029_v4, %v3028_v9 }
 0x268   :  { %v2484_v22 = vadd.f32 %v3030_v30, %v2435_v8 }
 0x279   :  { %v2223_v12 = vpop.f32.mrb[0].mxu0 }
 0x27a   :  { %v3031_v50 = vadd.f32 %v2223_v12, %v3895_v13  ;;  %v2225_v44 = vpop.f32.mrb[1].mxu0 }
 0x27b   :  { %v3032_v53 = vadd.f32 %v2225_v44, %v3897_v48  ;;  %v2227_v46 = vpop.f32.mrb[2].mxu0 }
 0x27c   :  { %v3033_v15 = vadd.f32 %v2227_v46, %v3899_v49  ;;  %v2229_v55 = vpop.f32.mrb[3].mxu0 }
 0x27d   :  { %v2876_v37 = vpack.c.bf16 %v2473_v20, %v3032_v53  ;;  %v3034_v29 = vadd.f32 %v2229_v55, %v3901_v42 }
 0x27e   :  { %v2883_v60 = vpack.c.bf16 %v3033_v15, %v3031_v50 }
 0x27f   :  { %2531 = vst [vmem:[#allocation10] sm:$0xff] %v2876_v37  ;;  %v2877_v61 = vpack.c.bf16 %v2476_v17, %v3034_v29 }
 0x280   :  { %2884 = vst [vmem:[#allocation8] sm:$0xff] %v2883_v60  }
 0x281   :  { %2532 = vst [vmem:[#allocation10 + $0x8] sm:$0xff] %v2877_v61  ;;  %v2233_v2 = vpop.f32.mrb[4].mxu0 }
 0x282   :  { %v3035_v16 = vadd.f32 %v2233_v2, %v3903_v0  ;;  %v2235_v43 = vpop.f32.mrb[5].mxu0 }
 0x283   :  { %v3036_v13 = vadd.f32 %v2235_v43, %v3905_v56  ;;  %v2237_v6 = vpop.f32.mrb[6].mxu0 }
 0x284   :  { %v3037_v48 = vadd.f32 %v2237_v6, %v3907_v36  ;;  %v2239_v49 = vpop.f32.mrb[7].mxu0 }
 0x285   :  { %v2878_v42 = vpack.c.bf16 %v2481_v54, %v3036_v13  ;;  %v3038_v1 = vadd.f32 %v2239_v49, %v3909_v63 }
 0x286   :  { %v2888_v23 = vpack.c.bf16 %v3037_v48, %v3035_v16 }
 0x287   :  { %2533 = vst [vmem:[#allocation10 + $0x10] sm:$0xff] %v2878_v42  ;;  %v2879_v0 = vpack.c.bf16 %v2484_v22, %v3038_v1 }
 0x288   :  { %2890 = vst [vmem:[#allocation8 + $0x8] sm:$0xff] %v2888_v23  }
 0x289   :  { %2534 = vst [vmem:[#allocation10 + $0x18] sm:$0xff] %v2879_v0 }
 0x28a   :  { %3481 = shalt.err (!%p3478_p0)
}
 0x28b   :  { %s3482_s7 = scalar_lea.hbm %s3968_s3, 256 }
 0x28c   :  { %p3483_p1 = scmp.ne.s32.totalorder %s3968_s3, %s3482_s7  ;;  %p3486_p2 = scmp.lt.u32.totalorder %s3482_s7, %s3968_s3 }
 0x28e   :  { %p3488_p3 = pnand %p3486_p2, %p3483_p1 }
 0x290   :  { %3491 = shalt.err (!%p3488_p3)
}
 0x291   :  { %s3531_s12 = smov 64   ;;  %s3532_s0 = smov 4  }
 0x292   :  { %2558 = dma.vmem_to_hbm [thread:$0]  %s2553_s25, 256, %s3968_s3, [#allocation9], %s3531_s12, %s3531_s12, %s3532_s0  }
 0x293   :  { %s3492_s15 = scalar_lea.vmem %s3934_s29, 512  ;;  %p3497_p5 = scmp.lt.s32.totalorder %s3934_s29, %s3934_s29 }
 0x294   :  { %p3493_p4 = scmp.ne.s32.totalorder %s3934_s29, %s3492_s15  ;;  %p3498_p6 = scmp.lt.s32.totalorder %s3492_s15, %s3492_s15 }
 0x296   :  { %p3499_p7 = por %p3498_p6, %p3497_p5 }
 0x298   :  { %p3500_p8 = pnand %p3499_p7, %p3493_p4 }
 0x29a   :  { %3503 = shalt.err (!%p3500_p8)
}
 0x29b   :  { %s3504_s17 = scalar_lea.hbm %s3969_s4, 512 }
 0x29c   :  { %p3505_p9 = scmp.ne.s32.totalorder %s3969_s4, %s3504_s17  ;;  %p3508_p10 = scmp.lt.u32.totalorder %s3504_s17, %s3969_s4 }
 0x29e   :  { %p3510_p11 = pnand %p3508_p10, %p3505_p9 }
 0x2a0   :  { %3513 = shalt.err (!%p3510_p11)
}
 0x2a1   :  { %s3533_s3 = smov 128   ;;  %s3534_s22 = smov 8  }
 0x2a2   :  { %2570 = dma.vmem_to_hbm [thread:$0]  %s3934_s29, 512, %s3969_s4, [#allocation9], %s3533_s3, %s3533_s3, %s3534_s22  }
 0x2a3   :  { %3518 = dma.done.wait [#allocation4], 2560  }
 0x2a4   :  { %3519 = vsyncadd [#allocation4], 4294964736 }
 0x2a5   :  { %3520 = dma.done.wait [#allocation9], 768  }
 0x2a6   :  { %3521 = vsyncadd [#allocation9], 4294966528 }
 0x2a7   :  { %2580 = vsyncpa [#allocation3], 1 }
 0x2a8   :  { %2581 = vsyncpa [#allocation6], 1 }
 0x2a9   :  { %2582 = vsyncpa [#allocation4], 1 }
 0x2aa   :  { %2583 = vsyncpa [#allocation9], 1 }

</bundles_post_ra>
